<compile_context>
chip_gen: v7x
topology: tpu7x:2x2x1
jax: 0.10.0
libtpu: 0.0.40
codegen_flags: <defaults>
</compile_context>

<pallas_src>
import jax
import jax.numpy as jnp
from jax import lax
from jax.experimental import pallas as pl
from jax.experimental.pallas import tpu as pltpu


def _round_up(x, m):
    return ((x + m - 1) // m) * m


# ------------------------------ kernel ---------------------------------
def context_encoder_kernel(x_ref, wih_ref, whh_ref, wp_ref, bp_ref, out_ref,
                           h_ref, c_ref, gx_ref, hbuf_ref):
    """One grid step = one (batch block, time chunk).

    x_ref    : (tile_rows, F)    f32   augmented inputs [x1 | x2 | 1 | 0pad],
                                       time-major rows within the chunk
    wih_ref  : (F, G)            f32   fused input weights (+biases via 1-col)
    whh_ref  : (H2p, G)          bf16  fused block-diagonal recurrent weights
    wp_ref   : (H2p, Opad)       bf16  zero-padded output projection
    bp_ref   : (1, Opad)         f32   zero-padded output bias
    out_ref  : (tile_rows, Opad) bf16  lane-dense output (Opad % 128 == 0)
    h_ref/c_ref : (Bb, H2p)      f32   persistent fused state [h1 | h2 | 0pad]
    gx_ref   : (tile_rows, G)    f32   per-chunk input-gate projections
    hbuf_ref : (tile_rows, H2p)  f32   per-chunk hidden states (lane-dense)

    Gate columns in G = 4*H2p: blocks [i | f | o | g]; each block is H2p wide
    with sub-layout [lstm1 (H) | lstm2 (H) | zero pad].  Padded lanes stay
    exactly zero through the recurrence (zero weight columns -> gates 0 ->
    c_pad = 0.5*c_pad = 0, h_pad = 0.5*tanh(0) = 0).
    """
    Bb, H2p = h_ref.shape
    tile_rows = hbuf_ref.shape[0]
    tile_t = tile_rows // Bb

    # New batch block -> reset recurrent state (time is grid axis 1).
    @pl.when(pl.program_id(1) == 0)
    def _():
        h_ref[...] = jnp.zeros_like(h_ref)
        c_ref[...] = jnp.zeros_like(c_ref)

    # In-kernel input projection for the whole chunk: one small matmul,
    # stored lane-dense into VMEM scratch (biases folded via constant-1 col).
    gx_ref[...] = jnp.dot(x_ref[...], wih_ref[...],
                          preferred_element_type=jnp.float32)

    def step(s, carry):
        h, c = carry
        row = pl.multiple_of(s * Bb, Bb)
        gx = gx_ref[pl.ds(row, Bb), :]                               # (Bb, G)
        gates = gx + jnp.dot(h.astype(jnp.bfloat16), whh_ref[...],
                             preferred_element_type=jnp.float32)     # (Bb, G)
        # All slice boundaries are multiples of 128 lanes (H2p % 128 == 0).
        sig = jax.nn.sigmoid(gates[:, :3 * H2p])                     # i | f | o
        g = jnp.tanh(gates[:, 3 * H2p:])
        i_g = sig[:, 0:H2p]
        f_g = sig[:, H2p:2 * H2p]
        o_g = sig[:, 2 * H2p:3 * H2p]
        c = f_g * c + i_g * g
        h = o_g * jnp.tanh(c)
        hbuf_ref[pl.ds(row, Bb), :] = h          # full (8,128) f32 tile store
        return h, c

    h, c = lax.fori_loop(0, tile_t, step, (h_ref[...], c_ref[...]),
                         unroll=True)
    h_ref[...] = h
    c_ref[...] = c

    # Deferred projection: ONE (tile_rows, H2p)x(H2p, Opad) matmul and one
    # lane-dense bf16 store per chunk.
    out_ref[...] = (jnp.dot(hbuf_ref[...].astype(jnp.bfloat16), wp_ref[...],
                            preferred_element_type=jnp.float32)
                    + bp_ref[...]).astype(out_ref.dtype)


# ------------------------------ wrapper --------------------------------
def context_encoder_forward(x1_btd, x2_bt1, params, *, tile_t=8, batch_block=8):
    """x1_btd: (B, T, input_size), x2_bt1: (B, T, 1) -> (B, T, output_size)."""
    B, T, I = x1_btd.shape
    H = params["whh1"].shape[0]          # whh* pre-transposed: (H, 4H)
    O = params["wp"].shape[1]            # wp pre-transposed:   (2H, O)

    H2 = 2 * H
    H2p = _round_up(H2, 128)             # fused hidden width, lane-tile aligned
    G = 4 * H2p                          # fused gate width [i | f | o | g]
    F = _round_up(I + 2, 8)              # [x1 | x2 | 1 | 0pad]
    Opad = _round_up(O, 128)             # lane-dense output width

    Bb = batch_block                     # per-core batch block (sublane tile)
    Bp = _round_up(max(B, Bb), Bb)
    NB = Bp // Bb
    Tp = _round_up(T, tile_t)
    NT = Tp // tile_t
    tile_rows = tile_t * Bb
    f32 = jnp.float32

    # --- augmented inputs: [x1 | x2 | 1 | 0pad], time-major within chunks ---
    x1p = jnp.pad(x1_btd.astype(f32), ((0, Bp - B), (0, Tp - T), (0, 0)))
    x2p = jnp.pad(x2_bt1.astype(f32), ((0, Bp - B), (0, Tp - T), (0, 0)))
    ones = jnp.ones((Bp, Tp, 1), f32)
    zpad = jnp.zeros((Bp, Tp, F - (I + 2)), f32)
    x_aug = jnp.concatenate([x1p, x2p, ones, zpad], axis=-1)        # (Bp,Tp,F)
    x_flat = (x_aug.reshape(NB, Bb, Tp, F)
              .transpose(0, 2, 1, 3)
              .reshape(NB * Tp * Bb, F))

    # --- fused weights (tiny; built once per call) --------------------------
    def gate_blocks(w):
        # columns of w: [i, f, g, o] (PyTorch order) -> kernel order [i, f, o, g]
        return (w[..., 0:H], w[..., H:2 * H], w[..., 3 * H:4 * H],
                w[..., 2 * H:3 * H])

    whh_f = jnp.zeros((H2p, G), f32)     # block-diagonal recurrent weight
    for gi, (wa, wb) in enumerate(zip(gate_blocks(params["whh1"]),
                                      gate_blocks(params["whh2"]))):
        c0 = gi * H2p
        whh_f = whh_f.at[0:H, c0:c0 + H].set(wa)
        whh_f = whh_f.at[H:H2, c0 + H:c0 + H2].set(wb)
    whh_f = whh_f.astype(jnp.bfloat16)

    wih_f = jnp.zeros((F, G), f32)       # fused input weight; biases on 1-row
    for gi, (wa, wb, ba, bb) in enumerate(zip(gate_blocks(params["wih1"]),
                                              gate_blocks(params["wih2"]),
                                              gate_blocks(params["b1"]),
                                              gate_blocks(params["b2"]))):
        c0 = gi * H2p
        wih_f = wih_f.at[0:I, c0:c0 + H].set(wa)
        wih_f = wih_f.at[I, c0 + H:c0 + H2].set(wb[0])
        wih_f = wih_f.at[I + 1, c0:c0 + H].set(ba[0])
        wih_f = wih_f.at[I + 1, c0 + H:c0 + H2].set(bb[0])

    wp_f = (jnp.zeros((H2p, Opad), f32)
            .at[0:H2, 0:O].set(params["wp"]).astype(jnp.bfloat16))
    bp_f = jnp.zeros((1, Opad), f32).at[0, 0:O].set(params["bp"][0])

    out_flat = pl.pallas_call(
        context_encoder_kernel,
        out_shape=jax.ShapeDtypeStruct((NB * Tp * Bb, Opad), jnp.bfloat16),
        grid_spec=pltpu.PrefetchScalarGridSpec(
            num_scalar_prefetch=0,
            grid=(NB, NT),
            in_specs=[
                pl.BlockSpec((tile_rows, F), lambda b, t: (b * NT + t, 0)),
                pl.BlockSpec((F, G), lambda b, t: (0, 0)),          # wih fused
                pl.BlockSpec((H2p, G), lambda b, t: (0, 0)),        # whh fused
                pl.BlockSpec((H2p, Opad), lambda b, t: (0, 0)),     # wp
                pl.BlockSpec((1, Opad), lambda b, t: (0, 0)),       # bp
            ],
            out_specs=pl.BlockSpec((tile_rows, Opad),
                                   lambda b, t: (b * NT + t, 0)),
            scratch_shapes=[
                pltpu.VMEM((Bb, H2p), jnp.float32),                 # h state
                pltpu.VMEM((Bb, H2p), jnp.float32),                 # c state
                pltpu.VMEM((tile_rows, G), jnp.float32),            # gx chunk
                pltpu.VMEM((tile_rows, H2p), jnp.float32),          # hbuf
            ],
        ),
        compiler_params=pltpu.CompilerParams(
            dimension_semantics=("parallel", "arbitrary")),
    )(x_flat, wih_f, whh_f, wp_f, bp_f)

    out = (out_flat.reshape(NB, Tp, Bb, Opad)
           .transpose(0, 2, 1, 3)
           .reshape(Bp, Tp, Opad)[:B, :T, :O])
    return out.astype(jnp.float32)                                  # (B, T, O)


# ------------------------- pure-JAX reference --------------------------
def _lstm_ref(x_btd, wih, whh, b, H):
    """x: (B, T, I); wih: (I, 4H); whh: (H, 4H); b: (1, 4H). Returns (B, T, H)."""
    B = x_btd.shape[0]

    def step(carry, x_t):
        h, c = carry
        gates = x_t @ wih + h @ whh + b
        i = jax.nn.sigmoid(gates[:, 0 * H:1 * H])
        f = jax.nn.sigmoid(gates[:, 1 * H:2 * H])
        g = jnp.tanh(gates[:, 2 * H:3 * H])
        o = jax.nn.sigmoid(gates[:, 3 * H:4 * H])
        c = f * c + i * g
        h = o * jnp.tanh(c)
        return (h, c), h

    h0 = jnp.zeros((B, H), jnp.float32)
    (_, _), hs = lax.scan(step, (h0, h0), jnp.transpose(x_btd, (1, 0, 2)))
    return jnp.transpose(hs, (1, 0, 2))


def context_encoder_ref(x1, x2, params):
    H = params["whh1"].shape[0]
    o1 = _lstm_ref(x1, params["wih1"], params["whh1"], params["b1"], H)
    o2 = _lstm_ref(x2, params["wih2"], params["whh2"], params["b2"], H)
    return jnp.concatenate([o1, o2], axis=-1) @ params["wp"] + params["bp"]


# -------------------------------- main ----------------------------------
if __name__ == "__main__":
    B, T = 2, 8
    input_size, hidden_size, output_size = 4, 32, 16
    H = hidden_size

    key = jax.random.PRNGKey(0)
    keys = jax.random.split(key, 12)
    scale = 0.1

    # Parameters stored pre-transposed (PyTorch -> kernel layout):
    #   wih*: (in, 4H), whh*: (H, 4H), b* = b_ih + b_hh as (1, 4H)
    #   wp: (2H, O), bp: (1, O); gate order i, f, g, o.
    params = {
        "wih1": scale * jax.random.normal(keys[0], (input_size, 4 * H), jnp.float32),
        "whh1": scale * jax.random.normal(keys[1], (H, 4 * H), jnp.float32),
        "b1":   scale * jax.random.normal(keys[2], (1, 4 * H), jnp.float32),
        "wih2": scale * jax.random.normal(keys[3], (1, 4 * H), jnp.float32),
        "whh2": scale * jax.random.normal(keys[4], (H, 4 * H), jnp.float32),
        "b2":   scale * jax.random.normal(keys[5], (1, 4 * H), jnp.float32),
        "wp":   scale * jax.random.normal(keys[6], (2 * H, output_size), jnp.float32),
        "bp":   scale * jax.random.normal(keys[7], (1, output_size), jnp.float32),
    }

    x1 = jax.random.normal(keys[8], (B, T, input_size), jnp.float32)
    x2 = jax.random.normal(keys[9], (B, T, 1), jnp.float32)

    out = context_encoder_forward(x1, x2, params, tile_t=8)
    out = jax.block_until_ready(out)

    ref = context_encoder_ref(x1, x2, params)
    assert out.shape == (B, T, output_size)
    # bf16 MXU operands / bf16 output store (f32 accumulate) -> loose tolerance.
    assert jnp.allclose(out, ref, atol=1e-2, rtol=1e-2), (
        "mismatch vs JAX reference, max abs diff = "
        f"{float(jnp.max(jnp.abs(out - ref)))}")

    print("KERNEL_OK")
</pallas_src>

<mosaic_0001>
module attributes {stable_mosaic.version = 11 : i64} {
  func.func @context_encoder_kernel(%arg0: i32, %arg1: i32, %arg2: memref<64x8xf32, #tpu.memory_space<vmem>>, %arg3: memref<8x512xf32, #tpu.memory_space<vmem>>, %arg4: memref<128x512xbf16, #tpu.memory_space<vmem>>, %arg5: memref<128x128xbf16, #tpu.memory_space<vmem>>, %arg6: memref<1x128xf32, #tpu.memory_space<vmem>>, %arg7: memref<64x128xbf16, #tpu.memory_space<vmem>>, %arg8: memref<8x128xf32, #tpu.memory_space<vmem>>, %arg9: memref<8x128xf32, #tpu.memory_space<vmem>>, %arg10: memref<64x512xf32, #tpu.memory_space<vmem>>, %arg11: memref<64x128xf32, #tpu.memory_space<vmem>>) attributes {dimension_semantics = [#tpu.dimension_semantics<parallel>, #tpu.dimension_semantics<arbitrary>], iteration_bounds = array<i64: 1, 1>, scalar_prefetch = 0 : i64, scratch_operands = 4 : i64, tpu.core_type = #tpu.core_type<tc>, window_params = [{transform_indices = @transform_0, window_bounds = array<i64: 64, 8>}, {pipeline_mode = #tpu.pipeline_mode<synchronous>, transform_indices = @transform_1, window_bounds = array<i64: 8, 512>}, {pipeline_mode = #tpu.pipeline_mode<synchronous>, transform_indices = @transform_2, window_bounds = array<i64: 128, 512>}, {pipeline_mode = #tpu.pipeline_mode<synchronous>, transform_indices = @transform_3, window_bounds = array<i64: 128, 128>}, {pipeline_mode = #tpu.pipeline_mode<synchronous>, transform_indices = @transform_4, window_bounds = array<i64: 1, 128>}, {transform_indices = @transform_5, window_bounds = array<i64: 64, 128>}]} {
    %c0_i32 = arith.constant 0 : i32
    %0 = arith.cmpi eq, %arg1, %c0_i32 : i32
    %1 = arith.extui %0 : i1 to i32
    %c0_i32_0 = arith.constant 0 : i32
    %2 = arith.cmpi ne, %1, %c0_i32_0 : i32
    scf.if %2 {
      %cst_80 = arith.constant 0.000000e+00 : f32
      %228 = vector.broadcast %cst_80 : f32 to vector<8x128xf32>
      %c0_81 = arith.constant 0 : index
      %c0_82 = arith.constant 0 : index
      %229 = vector.load %arg8[%c0_81, %c0_82] : memref<8x128xf32, #tpu.memory_space<vmem>>, vector<8x128xf32>
      tpu.vector_store %arg8[%c0_81, %c0_82], %228 {strides = array<i32>} : memref<8x128xf32, #tpu.memory_space<vmem>>, vector<8x128xf32>,
      %cst_83 = arith.constant 0.000000e+00 : f32
      %230 = vector.broadcast %cst_83 : f32 to vector<8x128xf32>
      %c0_84 = arith.constant 0 : index
      %c0_85 = arith.constant 0 : index
      %231 = vector.load %arg9[%c0_84, %c0_85] : memref<8x128xf32, #tpu.memory_space<vmem>>, vector<8x128xf32>
      tpu.vector_store %arg9[%c0_84, %c0_85], %230 {strides = array<i32>} : memref<8x128xf32, #tpu.memory_space<vmem>>, vector<8x128xf32>,
    } else {
    }
    %c0 = arith.constant 0 : index
    %c0_1 = arith.constant 0 : index
    %3 = vector.load %arg2[%c0, %c0_1] : memref<64x8xf32, #tpu.memory_space<vmem>>, vector<64x8xf32>
    %c0_2 = arith.constant 0 : index
    %c0_3 = arith.constant 0 : index
    %4 = vector.load %arg3[%c0_2, %c0_3] : memref<8x512xf32, #tpu.memory_space<vmem>>, vector<8x512xf32>
    %cst = arith.constant dense<0.000000e+00> : vector<64x512xf32>
    %5 = tpu.matmul %3, %4, %cst {dimension_numbers = #tpu.dot_dimension_numbers<[1], [0], [0], [1], [0, 0, 1, 1], [], []>} : vector<64x8xf32>, vector<8x512xf32>, vector<64x512xf32> -> vector<64x512xf32>
    %c0_4 = arith.constant 0 : index
    %c0_5 = arith.constant 0 : index
    %6 = vector.load %arg10[%c0_4, %c0_5] : memref<64x512xf32, #tpu.memory_space<vmem>>, vector<64x512xf32>
    tpu.vector_store %arg10[%c0_4, %c0_5], %5 {strides = array<i32>} : memref<64x512xf32, #tpu.memory_space<vmem>>, vector<64x512xf32>,
    %c0_6 = arith.constant 0 : index
    %c0_7 = arith.constant 0 : index
    %7 = vector.load %arg8[%c0_6, %c0_7] : memref<8x128xf32, #tpu.memory_space<vmem>>, vector<8x128xf32>
    %c0_8 = arith.constant 0 : index
    %c0_9 = arith.constant 0 : index
    %8 = vector.load %arg9[%c0_8, %c0_9] : memref<8x128xf32, #tpu.memory_space<vmem>>, vector<8x128xf32>
    %c0_i32_10 = arith.constant 0 : i32
    %c8_i32 = arith.constant 8 : i32
    %9 = arith.muli %c0_i32_10, %c8_i32 : i32
    %10 = tpu.assume_multiple %9, 8 : i32
    %11 = arith.index_cast %10 : i32 to index
    %c0_11 = arith.constant 0 : index
    %12 = vector.load %arg10[%11, %c0_11] : memref<64x512xf32, #tpu.memory_space<vmem>>, vector<8x512xf32>
    %13 = arith.truncf %7 : vector<8x128xf32> to vector<8x128xbf16>
    %c0_12 = arith.constant 0 : index
    %c0_13 = arith.constant 0 : index
    %14 = vector.load %arg4[%c0_12, %c0_13] : memref<128x512xbf16, #tpu.memory_space<vmem>>, vector<128x512xbf16>
    %cst_14 = arith.constant dense<0.000000e+00> : vector<8x512xf32>
    %15 = tpu.matmul %13, %14, %cst_14 {dimension_numbers = #tpu.dot_dimension_numbers<[1], [0], [0], [1], [0, 0, 1, 1], [], []>} : vector<8x128xbf16>, vector<128x512xbf16>, vector<8x512xf32> -> vector<8x512xf32>
    %16 = arith.addf %12, %15 : vector<8x512xf32>
    %17 = vector.extract_strided_slice %16 {offsets = [0, 0], sizes = [8, 384], strides = [1, 1]} : vector<8x512xf32> to vector<8x384xf32>
    %18 = arith.negf %17 : vector<8x384xf32>
    %19 = math.exp %18 : vector<8x384xf32>
    %cst_15 = arith.constant 1.000000e+00 : f32
    %20 = vector.broadcast %cst_15 : f32 to vector<8x384xf32>
    %21 = arith.addf %20, %19 : vector<8x384xf32>
    %22 = arith.divf %20, %21 : vector<8x384xf32>
    %23 = vector.extract_strided_slice %16 {offsets = [0, 384], sizes = [8, 128], strides = [1, 1]} : vector<8x512xf32> to vector<8x128xf32>
    %24 = math.tanh %23 : vector<8x128xf32>
    %25 = vector.extract_strided_slice %22 {offsets = [0, 0], sizes = [8, 128], strides = [1, 1]} : vector<8x384xf32> to vector<8x128xf32>
    %26 = vector.extract_strided_slice %22 {offsets = [0, 128], sizes = [8, 128], strides = [1, 1]} : vector<8x384xf32> to vector<8x128xf32>
    %27 = vector.extract_strided_slice %22 {offsets = [0, 256], sizes = [8, 128], strides = [1, 1]} : vector<8x384xf32> to vector<8x128xf32>
    %28 = arith.mulf %26, %8 : vector<8x128xf32>
    %29 = arith.mulf %25, %24 : vector<8x128xf32>
    %30 = arith.addf %28, %29 : vector<8x128xf32>
    %31 = math.tanh %30 : vector<8x128xf32>
    %32 = arith.mulf %27, %31 : vector<8x128xf32>
    %33 = arith.index_cast %10 : i32 to index
    %c0_16 = arith.constant 0 : index
    %34 = vector.load %arg11[%33, %c0_16] : memref<64x128xf32, #tpu.memory_space<vmem>>, vector<8x128xf32>
    tpu.vector_store %arg11[%33, %c0_16], %32 {strides = array<i32>} : memref<64x128xf32, #tpu.memory_space<vmem>>, vector<8x128xf32>,
    %c1_i32 = arith.constant 1 : i32
    %c8_i32_17 = arith.constant 8 : i32
    %35 = arith.muli %c1_i32, %c8_i32_17 : i32
    %36 = tpu.assume_multiple %35, 8 : i32
    %37 = arith.index_cast %36 : i32 to index
    %c0_18 = arith.constant 0 : index
    %38 = vector.load %arg10[%37, %c0_18] : memref<64x512xf32, #tpu.memory_space<vmem>>, vector<8x512xf32>
    %39 = arith.truncf %32 : vector<8x128xf32> to vector<8x128xbf16>
    %c0_19 = arith.constant 0 : index
    %c0_20 = arith.constant 0 : index
    %40 = vector.load %arg4[%c0_19, %c0_20] : memref<128x512xbf16, #tpu.memory_space<vmem>>, vector<128x512xbf16>
    %cst_21 = arith.constant dense<0.000000e+00> : vector<8x512xf32>
    %41 = tpu.matmul %39, %40, %cst_21 {dimension_numbers = #tpu.dot_dimension_numbers<[1], [0], [0], [1], [0, 0, 1, 1], [], []>} : vector<8x128xbf16>, vector<128x512xbf16>, vector<8x512xf32> -> vector<8x512xf32>
    %42 = arith.addf %38, %41 : vector<8x512xf32>
    %43 = vector.extract_strided_slice %42 {offsets = [0, 0], sizes = [8, 384], strides = [1, 1]} : vector<8x512xf32> to vector<8x384xf32>
    %44 = arith.negf %43 : vector<8x384xf32>
    %45 = math.exp %44 : vector<8x384xf32>
    %cst_22 = arith.constant 1.000000e+00 : f32
    %46 = vector.broadcast %cst_22 : f32 to vector<8x384xf32>
    %47 = arith.addf %46, %45 : vector<8x384xf32>
    %48 = arith.divf %46, %47 : vector<8x384xf32>
    %49 = vector.extract_strided_slice %42 {offsets = [0, 384], sizes = [8, 128], strides = [1, 1]} : vector<8x512xf32> to vector<8x128xf32>
    %50 = math.tanh %49 : vector<8x128xf32>
    %51 = vector.extract_strided_slice %48 {offsets = [0, 0], sizes = [8, 128], strides = [1, 1]} : vector<8x384xf32> to vector<8x128xf32>
    %52 = vector.extract_strided_slice %48 {offsets = [0, 128], sizes = [8, 128], strides = [1, 1]} : vector<8x384xf32> to vector<8x128xf32>
    %53 = vector.extract_strided_slice %48 {offsets = [0, 256], sizes = [8, 128], strides = [1, 1]} : vector<8x384xf32> to vector<8x128xf32>
    %54 = arith.mulf %52, %30 : vector<8x128xf32>
    %55 = arith.mulf %51, %50 : vector<8x128xf32>
    %56 = arith.addf %54, %55 : vector<8x128xf32>
    %57 = math.tanh %56 : vector<8x128xf32>
    %58 = arith.mulf %53, %57 : vector<8x128xf32>
    %59 = arith.index_cast %36 : i32 to index
    %c0_23 = arith.constant 0 : index
    %60 = vector.load %arg11[%59, %c0_23] : memref<64x128xf32, #tpu.memory_space<vmem>>, vector<8x128xf32>
    tpu.vector_store %arg11[%59, %c0_23], %58 {strides = array<i32>} : memref<64x128xf32, #tpu.memory_space<vmem>>, vector<8x128xf32>,
    %c2_i32 = arith.constant 2 : i32
    %c8_i32_24 = arith.constant 8 : i32
    %61 = arith.muli %c2_i32, %c8_i32_24 : i32
    %62 = tpu.assume_multiple %61, 8 : i32
    %63 = arith.index_cast %62 : i32 to index
    %c0_25 = arith.constant 0 : index
    %64 = vector.load %arg10[%63, %c0_25] : memref<64x512xf32, #tpu.memory_space<vmem>>, vector<8x512xf32>
    %65 = arith.truncf %58 : vector<8x128xf32> to vector<8x128xbf16>
    %c0_26 = arith.constant 0 : index
    %c0_27 = arith.constant 0 : index
    %66 = vector.load %arg4[%c0_26, %c0_27] : memref<128x512xbf16, #tpu.memory_space<vmem>>, vector<128x512xbf16>
    %cst_28 = arith.constant dense<0.000000e+00> : vector<8x512xf32>
    %67 = tpu.matmul %65, %66, %cst_28 {dimension_numbers = #tpu.dot_dimension_numbers<[1], [0], [0], [1], [0, 0, 1, 1], [], []>} : vector<8x128xbf16>, vector<128x512xbf16>, vector<8x512xf32> -> vector<8x512xf32>
    %68 = arith.addf %64, %67 : vector<8x512xf32>
    %69 = vector.extract_strided_slice %68 {offsets = [0, 0], sizes = [8, 384], strides = [1, 1]} : vector<8x512xf32> to vector<8x384xf32>
    %70 = arith.negf %69 : vector<8x384xf32>
    %71 = math.exp %70 : vector<8x384xf32>
    %cst_29 = arith.constant 1.000000e+00 : f32
    %72 = vector.broadcast %cst_29 : f32 to vector<8x384xf32>
    %73 = arith.addf %72, %71 : vector<8x384xf32>
    %74 = arith.divf %72, %73 : vector<8x384xf32>
    %75 = vector.extract_strided_slice %68 {offsets = [0, 384], sizes = [8, 128], strides = [1, 1]} : vector<8x512xf32> to vector<8x128xf32>
    %76 = math.tanh %75 : vector<8x128xf32>
    %77 = vector.extract_strided_slice %74 {offsets = [0, 0], sizes = [8, 128], strides = [1, 1]} : vector<8x384xf32> to vector<8x128xf32>
    %78 = vector.extract_strided_slice %74 {offsets = [0, 128], sizes = [8, 128], strides = [1, 1]} : vector<8x384xf32> to vector<8x128xf32>
    %79 = vector.extract_strided_slice %74 {offsets = [0, 256], sizes = [8, 128], strides = [1, 1]} : vector<8x384xf32> to vector<8x128xf32>
    %80 = arith.mulf %78, %56 : vector<8x128xf32>
    %81 = arith.mulf %77, %76 : vector<8x128xf32>
    %82 = arith.addf %80, %81 : vector<8x128xf32>
    %83 = math.tanh %82 : vector<8x128xf32>
    %84 = arith.mulf %79, %83 : vector<8x128xf32>
    %85 = arith.index_cast %62 : i32 to index
    %c0_30 = arith.constant 0 : index
    %86 = vector.load %arg11[%85, %c0_30] : memref<64x128xf32, #tpu.memory_space<vmem>>, vector<8x128xf32>
    tpu.vector_store %arg11[%85, %c0_30], %84 {strides = array<i32>} : memref<64x128xf32, #tpu.memory_space<vmem>>, vector<8x128xf32>,
    %c3_i32 = arith.constant 3 : i32
    %c8_i32_31 = arith.constant 8 : i32
    %87 = arith.muli %c3_i32, %c8_i32_31 : i32
    %88 = tpu.assume_multiple %87, 8 : i32
    %89 = arith.index_cast %88 : i32 to index
    %c0_32 = arith.constant 0 : index
    %90 = vector.load %arg10[%89, %c0_32] : memref<64x512xf32, #tpu.memory_space<vmem>>, vector<8x512xf32>
    %91 = arith.truncf %84 : vector<8x128xf32> to vector<8x128xbf16>
    %c0_33 = arith.constant 0 : index
    %c0_34 = arith.constant 0 : index
    %92 = vector.load %arg4[%c0_33, %c0_34] : memref<128x512xbf16, #tpu.memory_space<vmem>>, vector<128x512xbf16>
    %cst_35 = arith.constant dense<0.000000e+00> : vector<8x512xf32>
    %93 = tpu.matmul %91, %92, %cst_35 {dimension_numbers = #tpu.dot_dimension_numbers<[1], [0], [0], [1], [0, 0, 1, 1], [], []>} : vector<8x128xbf16>, vector<128x512xbf16>, vector<8x512xf32> -> vector<8x512xf32>
    %94 = arith.addf %90, %93 : vector<8x512xf32>
    %95 = vector.extract_strided_slice %94 {offsets = [0, 0], sizes = [8, 384], strides = [1, 1]} : vector<8x512xf32> to vector<8x384xf32>
    %96 = arith.negf %95 : vector<8x384xf32>
    %97 = math.exp %96 : vector<8x384xf32>
    %cst_36 = arith.constant 1.000000e+00 : f32
    %98 = vector.broadcast %cst_36 : f32 to vector<8x384xf32>
    %99 = arith.addf %98, %97 : vector<8x384xf32>
    %100 = arith.divf %98, %99 : vector<8x384xf32>
    %101 = vector.extract_strided_slice %94 {offsets = [0, 384], sizes = [8, 128], strides = [1, 1]} : vector<8x512xf32> to vector<8x128xf32>
    %102 = math.tanh %101 : vector<8x128xf32>
    %103 = vector.extract_strided_slice %100 {offsets = [0, 0], sizes = [8, 128], strides = [1, 1]} : vector<8x384xf32> to vector<8x128xf32>
    %104 = vector.extract_strided_slice %100 {offsets = [0, 128], sizes = [8, 128], strides = [1, 1]} : vector<8x384xf32> to vector<8x128xf32>
    %105 = vector.extract_strided_slice %100 {offsets = [0, 256], sizes = [8, 128], strides = [1, 1]} : vector<8x384xf32> to vector<8x128xf32>
    %106 = arith.mulf %104, %82 : vector<8x128xf32>
    %107 = arith.mulf %103, %102 : vector<8x128xf32>
    %108 = arith.addf %106, %107 : vector<8x128xf32>
    %109 = math.tanh %108 : vector<8x128xf32>
    %110 = arith.mulf %105, %109 : vector<8x128xf32>
    %111 = arith.index_cast %88 : i32 to index
    %c0_37 = arith.constant 0 : index
    %112 = vector.load %arg11[%111, %c0_37] : memref<64x128xf32, #tpu.memory_space<vmem>>, vector<8x128xf32>
    tpu.vector_store %arg11[%111, %c0_37], %110 {strides = array<i32>} : memref<64x128xf32, #tpu.memory_space<vmem>>, vector<8x128xf32>,
    %c4_i32 = arith.constant 4 : i32
    %c8_i32_38 = arith.constant 8 : i32
    %113 = arith.muli %c4_i32, %c8_i32_38 : i32
    %114 = tpu.assume_multiple %113, 8 : i32
    %115 = arith.index_cast %114 : i32 to index
    %c0_39 = arith.constant 0 : index
    %116 = vector.load %arg10[%115, %c0_39] : memref<64x512xf32, #tpu.memory_space<vmem>>, vector<8x512xf32>
    %117 = arith.truncf %110 : vector<8x128xf32> to vector<8x128xbf16>
    %c0_40 = arith.constant 0 : index
    %c0_41 = arith.constant 0 : index
    %118 = vector.load %arg4[%c0_40, %c0_41] : memref<128x512xbf16, #tpu.memory_space<vmem>>, vector<128x512xbf16>
    %cst_42 = arith.constant dense<0.000000e+00> : vector<8x512xf32>
    %119 = tpu.matmul %117, %118, %cst_42 {dimension_numbers = #tpu.dot_dimension_numbers<[1], [0], [0], [1], [0, 0, 1, 1], [], []>} : vector<8x128xbf16>, vector<128x512xbf16>, vector<8x512xf32> -> vector<8x512xf32>
    %120 = arith.addf %116, %119 : vector<8x512xf32>
    %121 = vector.extract_strided_slice %120 {offsets = [0, 0], sizes = [8, 384], strides = [1, 1]} : vector<8x512xf32> to vector<8x384xf32>
    %122 = arith.negf %121 : vector<8x384xf32>
    %123 = math.exp %122 : vector<8x384xf32>
    %cst_43 = arith.constant 1.000000e+00 : f32
    %124 = vector.broadcast %cst_43 : f32 to vector<8x384xf32>
    %125 = arith.addf %124, %123 : vector<8x384xf32>
    %126 = arith.divf %124, %125 : vector<8x384xf32>
    %127 = vector.extract_strided_slice %120 {offsets = [0, 384], sizes = [8, 128], strides = [1, 1]} : vector<8x512xf32> to vector<8x128xf32>
    %128 = math.tanh %127 : vector<8x128xf32>
    %129 = vector.extract_strided_slice %126 {offsets = [0, 0], sizes = [8, 128], strides = [1, 1]} : vector<8x384xf32> to vector<8x128xf32>
    %130 = vector.extract_strided_slice %126 {offsets = [0, 128], sizes = [8, 128], strides = [1, 1]} : vector<8x384xf32> to vector<8x128xf32>
    %131 = vector.extract_strided_slice %126 {offsets = [0, 256], sizes = [8, 128], strides = [1, 1]} : vector<8x384xf32> to vector<8x128xf32>
    %132 = arith.mulf %130, %108 : vector<8x128xf32>
    %133 = arith.mulf %129, %128 : vector<8x128xf32>
    %134 = arith.addf %132, %133 : vector<8x128xf32>
    %135 = math.tanh %134 : vector<8x128xf32>
    %136 = arith.mulf %131, %135 : vector<8x128xf32>
    %137 = arith.index_cast %114 : i32 to index
    %c0_44 = arith.constant 0 : index
    %138 = vector.load %arg11[%137, %c0_44] : memref<64x128xf32, #tpu.memory_space<vmem>>, vector<8x128xf32>
    tpu.vector_store %arg11[%137, %c0_44], %136 {strides = array<i32>} : memref<64x128xf32, #tpu.memory_space<vmem>>, vector<8x128xf32>,
    %c5_i32 = arith.constant 5 : i32
    %c8_i32_45 = arith.constant 8 : i32
    %139 = arith.muli %c5_i32, %c8_i32_45 : i32
    %140 = tpu.assume_multiple %139, 8 : i32
    %141 = arith.index_cast %140 : i32 to index
    %c0_46 = arith.constant 0 : index
    %142 = vector.load %arg10[%141, %c0_46] : memref<64x512xf32, #tpu.memory_space<vmem>>, vector<8x512xf32>
    %143 = arith.truncf %136 : vector<8x128xf32> to vector<8x128xbf16>
    %c0_47 = arith.constant 0 : index
    %c0_48 = arith.constant 0 : index
    %144 = vector.load %arg4[%c0_47, %c0_48] : memref<128x512xbf16, #tpu.memory_space<vmem>>, vector<128x512xbf16>
    %cst_49 = arith.constant dense<0.000000e+00> : vector<8x512xf32>
    %145 = tpu.matmul %143, %144, %cst_49 {dimension_numbers = #tpu.dot_dimension_numbers<[1], [0], [0], [1], [0, 0, 1, 1], [], []>} : vector<8x128xbf16>, vector<128x512xbf16>, vector<8x512xf32> -> vector<8x512xf32>
    %146 = arith.addf %142, %145 : vector<8x512xf32>
    %147 = vector.extract_strided_slice %146 {offsets = [0, 0], sizes = [8, 384], strides = [1, 1]} : vector<8x512xf32> to vector<8x384xf32>
    %148 = arith.negf %147 : vector<8x384xf32>
    %149 = math.exp %148 : vector<8x384xf32>
    %cst_50 = arith.constant 1.000000e+00 : f32
    %150 = vector.broadcast %cst_50 : f32 to vector<8x384xf32>
    %151 = arith.addf %150, %149 : vector<8x384xf32>
    %152 = arith.divf %150, %151 : vector<8x384xf32>
    %153 = vector.extract_strided_slice %146 {offsets = [0, 384], sizes = [8, 128], strides = [1, 1]} : vector<8x512xf32> to vector<8x128xf32>
    %154 = math.tanh %153 : vector<8x128xf32>
    %155 = vector.extract_strided_slice %152 {offsets = [0, 0], sizes = [8, 128], strides = [1, 1]} : vector<8x384xf32> to vector<8x128xf32>
    %156 = vector.extract_strided_slice %152 {offsets = [0, 128], sizes = [8, 128], strides = [1, 1]} : vector<8x384xf32> to vector<8x128xf32>
    %157 = vector.extract_strided_slice %152 {offsets = [0, 256], sizes = [8, 128], strides = [1, 1]} : vector<8x384xf32> to vector<8x128xf32>
    %158 = arith.mulf %156, %134 : vector<8x128xf32>
    %159 = arith.mulf %155, %154 : vector<8x128xf32>
    %160 = arith.addf %158, %159 : vector<8x128xf32>
    %161 = math.tanh %160 : vector<8x128xf32>
    %162 = arith.mulf %157, %161 : vector<8x128xf32>
    %163 = arith.index_cast %140 : i32 to index
    %c0_51 = arith.constant 0 : index
    %164 = vector.load %arg11[%163, %c0_51] : memref<64x128xf32, #tpu.memory_space<vmem>>, vector<8x128xf32>
    tpu.vector_store %arg11[%163, %c0_51], %162 {strides = array<i32>} : memref<64x128xf32, #tpu.memory_space<vmem>>, vector<8x128xf32>,
    %c6_i32 = arith.constant 6 : i32
    %c8_i32_52 = arith.constant 8 : i32
    %165 = arith.muli %c6_i32, %c8_i32_52 : i32
    %166 = tpu.assume_multiple %165, 8 : i32
    %167 = arith.index_cast %166 : i32 to index
    %c0_53 = arith.constant 0 : index
    %168 = vector.load %arg10[%167, %c0_53] : memref<64x512xf32, #tpu.memory_space<vmem>>, vector<8x512xf32>
    %169 = arith.truncf %162 : vector<8x128xf32> to vector<8x128xbf16>
    %c0_54 = arith.constant 0 : index
    %c0_55 = arith.constant 0 : index
    %170 = vector.load %arg4[%c0_54, %c0_55] : memref<128x512xbf16, #tpu.memory_space<vmem>>, vector<128x512xbf16>
    %cst_56 = arith.constant dense<0.000000e+00> : vector<8x512xf32>
    %171 = tpu.matmul %169, %170, %cst_56 {dimension_numbers = #tpu.dot_dimension_numbers<[1], [0], [0], [1], [0, 0, 1, 1], [], []>} : vector<8x128xbf16>, vector<128x512xbf16>, vector<8x512xf32> -> vector<8x512xf32>
    %172 = arith.addf %168, %171 : vector<8x512xf32>
    %173 = vector.extract_strided_slice %172 {offsets = [0, 0], sizes = [8, 384], strides = [1, 1]} : vector<8x512xf32> to vector<8x384xf32>
    %174 = arith.negf %173 : vector<8x384xf32>
    %175 = math.exp %174 : vector<8x384xf32>
    %cst_57 = arith.constant 1.000000e+00 : f32
    %176 = vector.broadcast %cst_57 : f32 to vector<8x384xf32>
    %177 = arith.addf %176, %175 : vector<8x384xf32>
    %178 = arith.divf %176, %177 : vector<8x384xf32>
    %179 = vector.extract_strided_slice %172 {offsets = [0, 384], sizes = [8, 128], strides = [1, 1]} : vector<8x512xf32> to vector<8x128xf32>
    %180 = math.tanh %179 : vector<8x128xf32>
    %181 = vector.extract_strided_slice %178 {offsets = [0, 0], sizes = [8, 128], strides = [1, 1]} : vector<8x384xf32> to vector<8x128xf32>
    %182 = vector.extract_strided_slice %178 {offsets = [0, 128], sizes = [8, 128], strides = [1, 1]} : vector<8x384xf32> to vector<8x128xf32>
    %183 = vector.extract_strided_slice %178 {offsets = [0, 256], sizes = [8, 128], strides = [1, 1]} : vector<8x384xf32> to vector<8x128xf32>
    %184 = arith.mulf %182, %160 : vector<8x128xf32>
    %185 = arith.mulf %181, %180 : vector<8x128xf32>
    %186 = arith.addf %184, %185 : vector<8x128xf32>
    %187 = math.tanh %186 : vector<8x128xf32>
    %188 = arith.mulf %183, %187 : vector<8x128xf32>
    %189 = arith.index_cast %166 : i32 to index
    %c0_58 = arith.constant 0 : index
    %190 = vector.load %arg11[%189, %c0_58] : memref<64x128xf32, #tpu.memory_space<vmem>>, vector<8x128xf32>
    tpu.vector_store %arg11[%189, %c0_58], %188 {strides = array<i32>} : memref<64x128xf32, #tpu.memory_space<vmem>>, vector<8x128xf32>,
    %c7_i32 = arith.constant 7 : i32
    %c8_i32_59 = arith.constant 8 : i32
    %191 = arith.muli %c7_i32, %c8_i32_59 : i32
    %192 = tpu.assume_multiple %191, 8 : i32
    %193 = arith.index_cast %192 : i32 to index
    %c0_60 = arith.constant 0 : index
    %194 = vector.load %arg10[%193, %c0_60] : memref<64x512xf32, #tpu.memory_space<vmem>>, vector<8x512xf32>
    %195 = arith.truncf %188 : vector<8x128xf32> to vector<8x128xbf16>
    %c0_61 = arith.constant 0 : index
    %c0_62 = arith.constant 0 : index
    %196 = vector.load %arg4[%c0_61, %c0_62] : memref<128x512xbf16, #tpu.memory_space<vmem>>, vector<128x512xbf16>
    %cst_63 = arith.constant dense<0.000000e+00> : vector<8x512xf32>
    %197 = tpu.matmul %195, %196, %cst_63 {dimension_numbers = #tpu.dot_dimension_numbers<[1], [0], [0], [1], [0, 0, 1, 1], [], []>} : vector<8x128xbf16>, vector<128x512xbf16>, vector<8x512xf32> -> vector<8x512xf32>
    %198 = arith.addf %194, %197 : vector<8x512xf32>
    %199 = vector.extract_strided_slice %198 {offsets = [0, 0], sizes = [8, 384], strides = [1, 1]} : vector<8x512xf32> to vector<8x384xf32>
    %200 = arith.negf %199 : vector<8x384xf32>
    %201 = math.exp %200 : vector<8x384xf32>
    %cst_64 = arith.constant 1.000000e+00 : f32
    %202 = vector.broadcast %cst_64 : f32 to vector<8x384xf32>
    %203 = arith.addf %202, %201 : vector<8x384xf32>
    %204 = arith.divf %202, %203 : vector<8x384xf32>
    %205 = vector.extract_strided_slice %198 {offsets = [0, 384], sizes = [8, 128], strides = [1, 1]} : vector<8x512xf32> to vector<8x128xf32>
    %206 = math.tanh %205 : vector<8x128xf32>
    %207 = vector.extract_strided_slice %204 {offsets = [0, 0], sizes = [8, 128], strides = [1, 1]} : vector<8x384xf32> to vector<8x128xf32>
    %208 = vector.extract_strided_slice %204 {offsets = [0, 128], sizes = [8, 128], strides = [1, 1]} : vector<8x384xf32> to vector<8x128xf32>
    %209 = vector.extract_strided_slice %204 {offsets = [0, 256], sizes = [8, 128], strides = [1, 1]} : vector<8x384xf32> to vector<8x128xf32>
    %210 = arith.mulf %208, %186 : vector<8x128xf32>
    %211 = arith.mulf %207, %206 : vector<8x128xf32>
    %212 = arith.addf %210, %211 : vector<8x128xf32>
    %213 = math.tanh %212 : vector<8x128xf32>
    %214 = arith.mulf %209, %213 : vector<8x128xf32>
    %215 = arith.index_cast %192 : i32 to index
    %c0_65 = arith.constant 0 : index
    %216 = vector.load %arg11[%215, %c0_65] : memref<64x128xf32, #tpu.memory_space<vmem>>, vector<8x128xf32>
    tpu.vector_store %arg11[%215, %c0_65], %214 {strides = array<i32>} : memref<64x128xf32, #tpu.memory_space<vmem>>, vector<8x128xf32>,
    %c8_i32_66 = arith.constant 8 : i32
    %c0_67 = arith.constant 0 : index
    %c0_68 = arith.constant 0 : index
    %217 = vector.load %arg8[%c0_67, %c0_68] : memref<8x128xf32, #tpu.memory_space<vmem>>, vector<8x128xf32>
    tpu.vector_store %arg8[%c0_67, %c0_68], %214 {strides = array<i32>} : memref<8x128xf32, #tpu.memory_space<vmem>>, vector<8x128xf32>,
    %c0_69 = arith.constant 0 : index
    %c0_70 = arith.constant 0 : index
    %218 = vector.load %arg9[%c0_69, %c0_70] : memref<8x128xf32, #tpu.memory_space<vmem>>, vector<8x128xf32>
    tpu.vector_store %arg9[%c0_69, %c0_70], %212 {strides = array<i32>} : memref<8x128xf32, #tpu.memory_space<vmem>>, vector<8x128xf32>,
    %c0_71 = arith.constant 0 : index
    %c0_72 = arith.constant 0 : index
    %219 = vector.load %arg11[%c0_71, %c0_72] : memref<64x128xf32, #tpu.memory_space<vmem>>, vector<64x128xf32>
    %220 = arith.truncf %219 : vector<64x128xf32> to vector<64x128xbf16>
    %c0_73 = arith.constant 0 : index
    %c0_74 = arith.constant 0 : index
    %221 = vector.load %arg5[%c0_73, %c0_74] : memref<128x128xbf16, #tpu.memory_space<vmem>>, vector<128x128xbf16>
    %cst_75 = arith.constant dense<0.000000e+00> : vector<64x128xf32>
    %222 = tpu.matmul %220, %221, %cst_75 {dimension_numbers = #tpu.dot_dimension_numbers<[1], [0], [0], [1], [0, 0, 1, 1], [], []>} : vector<64x128xbf16>, vector<128x128xbf16>, vector<64x128xf32> -> vector<64x128xf32>
    %c0_76 = arith.constant 0 : index
    %c0_77 = arith.constant 0 : index
    %223 = vector.load %arg6[%c0_76, %c0_77] : memref<1x128xf32, #tpu.memory_space<vmem>>, vector<1x128xf32>
    %224 = vector.broadcast %223 : vector<1x128xf32> to vector<64x128xf32>
    %225 = arith.addf %222, %224 : vector<64x128xf32>
    %226 = arith.truncf %225 : vector<64x128xf32> to vector<64x128xbf16>
    %c0_78 = arith.constant 0 : index
    %c0_79 = arith.constant 0 : index
    %227 = vector.load %arg7[%c0_78, %c0_79] : memref<64x128xbf16, #tpu.memory_space<vmem>>, vector<64x128xbf16>
    tpu.vector_store %arg7[%c0_78, %c0_79], %226 {strides = array<i32>} : memref<64x128xbf16, #tpu.memory_space<vmem>>, vector<64x128xbf16>,
    return
  }
  func.func @transform_0(%arg0: i32, %arg1: i32) -> (i32, i32) {
    %c1_i32 = arith.constant 1 : i32
    %0 = arith.muli %arg0, %c1_i32 : i32
    %1 = arith.addi %0, %arg1 : i32
    %c0_i32 = arith.constant 0 : i32
    %c0_i32_0 = arith.constant 0 : i32
    return %1, %c0_i32 : i32, i32
  }
  func.func @transform_1(%arg0: i32, %arg1: i32) -> (i32, i32) {
    %c0_i32 = arith.constant 0 : i32
    %c0_i32_0 = arith.constant 0 : i32
    %c0_i32_1 = arith.constant 0 : i32
    return %c0_i32, %c0_i32_0 : i32, i32
  }
  func.func @transform_2(%arg0: i32, %arg1: i32) -> (i32, i32) {
    %c0_i32 = arith.constant 0 : i32
    %c0_i32_0 = arith.constant 0 : i32
    %c0_i32_1 = arith.constant 0 : i32
    return %c0_i32, %c0_i32_0 : i32, i32
  }
  func.func @transform_3(%arg0: i32, %arg1: i32) -> (i32, i32) {
    %c0_i32 = arith.constant 0 : i32
    %c0_i32_0 = arith.constant 0 : i32
    %c0_i32_1 = arith.constant 0 : i32
    return %c0_i32, %c0_i32_0 : i32, i32
  }
  func.func @transform_4(%arg0: i32, %arg1: i32) -> (i32, i32) {
    %c0_i32 = arith.constant 0 : i32
    %c0_i32_0 = arith.constant 0 : i32
    %c0_i32_1 = arith.constant 0 : i32
    return %c0_i32, %c0_i32_0 : i32, i32
  }
  func.func @transform_5(%arg0: i32, %arg1: i32) -> (i32, i32) {
    %c1_i32 = arith.constant 1 : i32
    %0 = arith.muli %arg0, %c1_i32 : i32
    %1 = arith.addi %0, %arg1 : i32
    %c0_i32 = arith.constant 0 : i32
    %c0_i32_0 = arith.constant 0 : i32
    return %1, %c0_i32 : i32, i32
  }
}

</mosaic_0001>

<bundles_post_ra>
// kernel: tpu_custom_call.1
= control target key start
LH: loop header
LB: loop body
LE: loop exit
PB: predicated region body
PF: predicated region fallthrough
CT: control target
= control target key end

     0   :  { %10 = vsyncpa [#allocation7], 0  ;;  %s4502_s0 = inlined_call_operand.vmem [shape: f32[64,8], index: 0, kind: input, shape index: {}]   ;;  %s4503_s1 = inlined_call_operand.hbm [shape: f32[8,512], index: 1, kind: input, shape index: {}]   ;;  %s4504_s2 = inlined_call_operand.hbm [shape: bf16[128,512], index: 2, kind: input, shape index: {}]   ;;  %s4505_s3 = inlined_call_operand.vmem [shape: bf16[128,128], index: 3, kind: input, shape index: {}]   ;;  %s4506_s4 = inlined_call_operand.vmem [shape: f32[1,128], index: 4, kind: input, shape index: {}]   ;;  %s4507_s5 = inlined_call_operand.hbm [shape: bf16[64,128], index: 5, kind: output, shape index: {}]  }
   0x1   :  { %11 = vsyncpa [#allocation10], 0 }
   0x2   :  { %12 = vsyncpa [#allocation8], 0  ;;  %s3789_s18 = smov [#allocation6]   ;;  %s3790_s20 = smov [#allocation9]  }
   0x3   :  { %s29_s19 = sshll.u32 %s3789_s18, 4  ;;  %s38_s21 = sshll.u32 %s3790_s20, 4  ;;  %s30_s19 = int_to_ptr.vmem [resolvable:$true] %s29_s19  ;;  %s3829_s21 = int_to_ptr.vmem [resolvable:$true] %s38_s21 }
   0x4   :  { %s3717_s24 = scalar_lea.hbm %s4503_s1, 512 }
   0x5   :  { %p3718_p0 = scmp.ne.s32.totalorder %s4503_s1, %s3717_s24  ;;  %p3721_p1 = scmp.lt.u32.totalorder %s3717_s24, %s4503_s1 }
   0x7   :  { %p3723_p2 = pnand %p3721_p1, %p3718_p0 }
   0x9   :  { %3726 = shalt.err (!%p3723_p2)
}
   0xa   :  { %s3727_s29 = scalar_lea.vmem %s30_s19, 512  ;;  %p3732_p4 = scmp.lt.s32.totalorder %s30_s19, %s30_s19 }
   0xb   :  { %p3728_p3 = scmp.ne.s32.totalorder %s30_s19, %s3727_s29  ;;  %p3733_p5 = scmp.lt.s32.totalorder %s3727_s29, %s3727_s29 }
   0xd   :  { %p3734_p6 = por %p3733_p5, %p3732_p4 }
   0xf   :  { %p3735_p7 = pnand %p3734_p6, %p3728_p3 }
  0x11   :  { %3738 = shalt.err (!%p3735_p7)
}
  0x12   :  { %32 = dma.hbm_to_vmem [thread:$0]  %s4503_s1, 512, %s30_s19, [#allocation7]  }
  0x13   :  { %s3739_s9 = scalar_lea.hbm %s4504_s2, 4096 }
  0x14   :  { %p3740_p8 = scmp.ne.s32.totalorder %s4504_s2, %s3739_s9  ;;  %p3743_p9 = scmp.lt.u32.totalorder %s3739_s9, %s4504_s2 }
  0x16   :  { %p3745_p10 = pnand %p3743_p9, %p3740_p8 }
  0x18   :  { %3748 = shalt.err (!%p3745_p10)
}
  0x19   :  { %s3749_s14 = scalar_lea.vmem %s3829_s21, 4096  ;;  %p3754_p12 = scmp.lt.s32.totalorder %s3829_s21, %s3829_s21 }
  0x1a   :  { %p3750_p11 = scmp.ne.s32.totalorder %s3829_s21, %s3749_s14  ;;  %p3755_p13 = scmp.lt.s32.totalorder %s3749_s14, %s3749_s14 }
  0x1c   :  { %p3756_p0 = por %p3755_p13, %p3754_p12 }
  0x1e   :  { %p3757_p1 = pnand %p3756_p0, %p3750_p11 }
  0x20   :  { %3760 = shalt.err (!%p3757_p1)
}
  0x21   :  { %s3791_s1 = smov 256   ;;  %s3792_s15 = smov 16  }
  0x22   :  { %44 = dma.hbm_to_vmem [thread:$0]  %s4504_s2, 4096, %s3829_s21, [#allocation10], %s3791_s1, %s3791_s1, %s3792_s15  }
  0x23   :  { %3783 = dma.done.wait [#allocation7], 512  }
  0x24   :  { %3784 = vsyncadd [#allocation7], 4294966784 }
  0x25   :  { %3785 = dma.done.wait [#allocation10], 4096  }
  0x26   :  { %3786 = vsyncadd [#allocation10], 4294963200  ;;  %v3793_v0 = vmov 0.0   ;;  %v89_v1 = vld [vmem:[#allocation6 + $0x18] sm:$0xff]  ;;  %v88_v2 = vld [vmem:[#allocation6 + $0x10] sm:$0xff]  ;;  %vm90_vm0 = vcmask 64512  }
  0x27   :  { %292 = vmatprep.mubr.f32.mxu1 %v3793_v0  ;;  %179 = vmatprep.mubr.f32.mxu0 %v3793_v0  ;;  %v78_v3 = vld [vmem:[%s4502_s0] sm:$0xff]  ;;  %v79_v7 = vld [vmem:[%s4502_s0 + $0x8] sm:$0xff]  ;;  %v80_v10 = vld [vmem:[%s4502_s0 + $0x10] sm:$0xff]  ;;  %v4508_v31 = vmov 0   ;;  %v3795_v34 = vmov 0.0|0.0  }
  0x28   :  { %228 = vmatprep.subr.mxu1 %v89_v1  ;;  %v3865_v4 = vld [vmem:[#allocation9] ss:$16 sps:$4 sm:$0xff]   ;;  %v3867_v5 = vld [vmem:[#allocation9 + $0x4] ss:$16 sps:$4 sm:$0xff]   ;;  %v81_v13 = vld [vmem:[%s4502_s0 + $0x18] sm:$0xff] }
  0x29   :  { %229 = vmatpush1.msra.mxu1 %v88_v2  ;;  %v3870_v6 = vld [vmem:[#allocation9 + $0x24] ss:$16 sps:$4 sm:$0xff]   ;;  %v3878_v8 = vld [vmem:[#allocation9 + $0x20] ss:$16 sps:$4 sm:$0xff]   ;;  %v87_v16 = vld [vmem:[#allocation6 + $0x8] sm:$0xff] }
  0x2a   :  { %3103 = vmatmul.mubr.msk.f32.vlgmr.msra.gmra.mrb[0].mxu1 %vm90_vm0, %v78_v3  ;;  %575 = vmatprep.subr.bf16.mxu1 %v3867_v5  ;;  %v3881_v9 = vld [vmem:[#allocation9 + $0x44] ss:$16 sps:$4 sm:$0xff]   ;;  %v3889_v11 = vld [vmem:[#allocation9 + $0x40] ss:$16 sps:$4 sm:$0xff]   ;;  %v83_v21 = vld [vmem:[%s4502_s0 + $0x28] sm:$0xff] }
  0x2b   :  { %298 = vmatprep.mubr.f32.mxu1 %v3793_v0  ;;  %576 = vmatpush1.bf16.msra.mxu1 %v3865_v4  ;;  %v3892_v12 = vld [vmem:[#allocation9 + $0x64] ss:$16 sps:$4 sm:$0xff]   ;;  %v3900_v14 = vld [vmem:[#allocation9 + $0x60] ss:$16 sps:$4 sm:$0xff]   ;;  %v85_v27 = vld [vmem:[%s4502_s0 + $0x38] sm:$0xff] }
  0x2c   :  { %577 = vmatprep.subr.bf16.mxu1 %v3870_v6  ;;  %v3902_v15 = vld [vmem:[#allocation9 + $0x84] ss:$16 sps:$4 sm:$0xff]   ;;  %115 = vmatprep.subr.mxu0 %v87_v16  ;;  %v3911_v19 = vld [vmem:[#allocation9 + $0x80] ss:$16 sps:$4 sm:$0xff]   ;;  %v3956_v29 = vld [vmem:[#allocation9 + $0xc] ss:$16 sps:$4 sm:$0xff]  }
  0x2d   :  { %v86_v17 = vld [vmem:[#allocation6] sm:$0xff]  ;;  %v84_v24 = vld [vmem:[%s4502_s0 + $0x30] sm:$0xff]  ;;  %v3964_v30 = vld [vmem:[#allocation9 + $0x8] ss:$16 sps:$4 sm:$0xff]  }
  0x2e   :  { %3104 = vmatmul.mubr.msk.f32.gmra.mrb[2].mxu1 %vm90_vm0, %v79_v7  ;;  %v82_v18 = vld [vmem:[%s4502_s0 + $0x20] sm:$0xff]  ;;  %116 = vmatpush1.msra.mxu0 %v86_v17  ;;  %v3968_v32 = vld [vmem:[#allocation9 + $0x2c] ss:$16 sps:$4 sm:$0xff]   ;;  %v3975_v33 = vld [vmem:[#allocation9 + $0x28] ss:$16 sps:$4 sm:$0xff]  }
  0x2f   :  { %304 = vmatprep.mubr.f32.mxu1 %v3793_v0  ;;  %578 = vmatpush1.bf16.msra.mxu1 %v3878_v8  ;;  %v3915_v20 = vld [vmem:[#allocation9 + $0xa4] ss:$16 sps:$4 sm:$0xff]   ;;  %v3926_v22 = vld [vmem:[#allocation9 + $0xa0] ss:$16 sps:$4 sm:$0xff]   ;;  %v3979_v35 = vld [vmem:[#allocation9 + $0x4c] ss:$16 sps:$4 sm:$0xff]  }
  0x30   :  { %579 = vmatprep.subr.bf16.mxu1 %v3881_v9  ;;  %3095 = vmatmul.mubr.msk.f32.vlgmr.msra.gmra.mrb[0].mxu0 %vm90_vm0, %v78_v3  ;;  %v3930_v23 = vld [vmem:[#allocation9 + $0xc4] ss:$16 sps:$4 sm:$0xff]   ;;  %v3939_v25 = vld [vmem:[#allocation9 + $0xc0] ss:$16 sps:$4 sm:$0xff]   ;;  %v3990_v36 = vld [vmem:[#allocation9 + $0x48] ss:$16 sps:$4 sm:$0xff]  }
  0x31   :  { %886 = vmatprep.subr.bf16.mxu0 %v3867_v5  ;;  %185 = vmatprep.mubr.f32.mxu0 %v3793_v0  ;;  %v3943_v26 = vld [vmem:[#allocation9 + $0xe4] ss:$16 sps:$4 sm:$0xff]   ;;  %v3952_v28 = vld [vmem:[#allocation9 + $0xe0] ss:$16 sps:$4 sm:$0xff]   ;;  %v3993_v37 = vld [vmem:[#allocation9 + $0x6c] ss:$16 sps:$4 sm:$0xff]  }
  0x32   :  { %3105 = vmatmul.mubr.msk.f32.gmra.mrb[4].mxu1 %vm90_vm0, %v80_v10  ;;  %887 = vmatpush1.bf16.msra.mxu0 %v3865_v4  ;;  %v4000_v38 = vld [vmem:[#allocation9 + $0x68] ss:$16 sps:$4 sm:$0xff]   ;;  %v4003_v39 = vld [vmem:[#allocation9 + $0x8c] ss:$16 sps:$4 sm:$0xff]  }
  0x33   :  { %310 = vmatprep.mubr.f32.mxu1 %v3793_v0  ;;  %580 = vmatpush1.bf16.msra.mxu1 %v3889_v11  ;;  %v4010_v40 = vld [vmem:[#allocation9 + $0x88] ss:$16 sps:$4 sm:$0xff]   ;;  %v4013_v41 = vld [vmem:[#allocation9 + $0xac] ss:$16 sps:$4 sm:$0xff]  }
  0x34   :  { %581 = vmatprep.subr.bf16.mxu1 %v3892_v12  ;;  %3096 = vmatmul.mubr.msk.f32.gmra.mrb[2].mxu0 %vm90_vm0, %v79_v7  ;;  %v4016_v42 = vld [vmem:[#allocation9 + $0xa8] ss:$16 sps:$4 sm:$0xff]   ;;  %v4019_v43 = vld [vmem:[#allocation9 + $0xcc] ss:$16 sps:$4 sm:$0xff]  }
  0x35   :  { %888 = vmatprep.subr.bf16.mxu0 %v3870_v6  ;;  %191 = vmatprep.mubr.f32.mxu0 %v3793_v0  ;;  %v4022_v44 = vld [vmem:[#allocation9 + $0xc8] ss:$16 sps:$4 sm:$0xff]   ;;  %v4025_v45 = vld [vmem:[#allocation9 + $0xec] ss:$16 sps:$4 sm:$0xff]  }
  0x36   :  { %3106 = vmatmul.mubr.msk.f32.gmra.mrb[6].mxu1 %vm90_vm0, %v81_v13  ;;  %889 = vmatpush1.bf16.msra.mxu0 %v3878_v8  ;;  %v4028_v46 = vld [vmem:[#allocation9 + $0xe8] ss:$16 sps:$4 sm:$0xff]  }
  0x37   :  { %316 = vmatprep.mubr.f32.mxu1 %v3793_v0  ;;  %582 = vmatpush1.bf16.msra.mxu1 %v3900_v14 }
  0x38   :  { %583 = vmatprep.subr.bf16.mxu1 %v3902_v15  ;;  %3097 = vmatmul.mubr.msk.f32.gmra.mrb[4].mxu0 %vm90_vm0, %v80_v10 }
  0x39   :  { %890 = vmatprep.subr.bf16.mxu0 %v3881_v9  ;;  %197 = vmatprep.mubr.f32.mxu0 %v3793_v0 }
  0x3a   :  { %3107 = vmatmul.mubr.msk.f32.gmra.mrb[8].mxu1 %vm90_vm0, %v82_v18  ;;  %891 = vmatpush1.bf16.msra.mxu0 %v3889_v11 }
  0x3b   :  { %322 = vmatprep.mubr.f32.mxu1 %v3793_v0  ;;  %584 = vmatpush1.bf16.msra.mxu1 %v3911_v19 }
  0x3c   :  { %585 = vmatprep.subr.bf16.mxu1 %v3915_v20  ;;  %3098 = vmatmul.mubr.msk.f32.gmra.mrb[6].mxu0 %vm90_vm0, %v81_v13 }
  0x3d   :  { %892 = vmatprep.subr.bf16.mxu0 %v3892_v12  ;;  %203 = vmatprep.mubr.f32.mxu0 %v3793_v0 }
  0x3e   :  { %3108 = vmatmul.mubr.msk.f32.gmra.mrb[10].mxu1 %vm90_vm0, %v83_v21  ;;  %893 = vmatpush1.bf16.msra.mxu0 %v3900_v14 }
  0x3f   :  { %328 = vmatprep.mubr.f32.mxu1 %v3793_v0  ;;  %586 = vmatpush1.bf16.msra.mxu1 %v3926_v22 }
  0x40   :  { %587 = vmatprep.subr.bf16.mxu1 %v3930_v23  ;;  %3099 = vmatmul.mubr.msk.f32.gmra.mrb[8].mxu0 %vm90_vm0, %v82_v18 }
  0x41   :  { %894 = vmatprep.subr.bf16.mxu0 %v3902_v15  ;;  %209 = vmatprep.mubr.f32.mxu0 %v3793_v0 }
  0x42   :  { %3109 = vmatmul.mubr.msk.f32.gmra.mrb[12].mxu1 %vm90_vm0, %v84_v24  ;;  %895 = vmatpush1.bf16.msra.mxu0 %v3911_v19 }
  0x43   :  { %334 = vmatprep.mubr.f32.mxu1 %v3793_v0  ;;  %588 = vmatpush1.bf16.msra.mxu1 %v3939_v25 }
  0x44   :  { %589 = vmatprep.subr.bf16.mxu1 %v3943_v26  ;;  %896 = vmatprep.subr.bf16.mxu0 %v3915_v20 }
  0x45   :  { %3100 = vmatmul.mubr.msk.f32.gmra.mrb[10].mxu0 %vm90_vm0, %v83_v21 }
  0x46   :  { %3110 = vmatmul.mubr.msk.f32.gmra.mrb[14].mxu1 %vm90_vm0, %v85_v27  ;;  %897 = vmatpush1.bf16.msra.mxu0 %v3926_v22 }
  0x47   :  { %607 = vmatprep.mubr.bf16.mxu1 %v4508_v31  ;;  %590 = vmatpush1.bf16.msra.mxu1 %v3952_v28 }
  0x48   :  { %616 = vmatprep.subr.bf16.mxu1 %v3956_v29  ;;  %215 = vmatprep.mubr.f32.mxu0 %v3793_v0 }
  0x49   :  { %898 = vmatprep.subr.bf16.mxu0 %v3930_v23  ;;  %3101 = vmatmul.mubr.msk.f32.gmra.mrb[12].mxu0 %vm90_vm0, %v84_v24 }
  0x4a   :  { %608 = vmatmul.mubr.bf16.vlgmr.msra.gmra.mrb[16].mxu1 %v3795_v34  ;;  %899 = vmatpush1.bf16.msra.mxu0 %v3939_v25 }
  0x4b   :  { %617 = vmatpush1.bf16.msra.mxu1 %v3964_v30  ;;  %648 = vmatprep.mubr.bf16.mxu1 %v4508_v31 }
  0x4c   :  { %618 = vmatprep.subr.bf16.mxu1 %v3968_v32  ;;  %221 = vmatprep.mubr.f32.mxu0 %v3793_v0 }
  0x4d   :  { %900 = vmatprep.subr.bf16.mxu0 %v3943_v26  ;;  %3102 = vmatmul.mubr.msk.f32.gmra.mrb[14].mxu0 %vm90_vm0, %v85_v27 }
  0x4e   :  { %901 = vmatpush1.bf16.msra.mxu0 %v3952_v28  ;;  %918 = vmatprep.mubr.bf16.mxu0 %v4508_v31 }
  0x4f   :  { %619 = vmatpush1.bf16.msra.mxu1 %v3975_v33  ;;  %1198 = vmatprep.subr.bf16.mxu0 %v3867_v5 }
  0x50   :  { %620 = vmatprep.subr.bf16.mxu1 %v3979_v35 }
  0x53   :  { %621 = vmatpush1.bf16.msra.mxu1 %v3990_v36 }
  0x54   :  { %622 = vmatprep.subr.bf16.mxu1 %v3993_v37 }
  0x57   :  { %623 = vmatpush1.bf16.msra.mxu1 %v4000_v38 }
  0x58   :  { %624 = vmatprep.subr.bf16.mxu1 %v4003_v39 }
  0x5b   :  { %625 = vmatpush1.bf16.msra.mxu1 %v4010_v40 }
  0x5c   :  { %626 = vmatprep.subr.bf16.mxu1 %v4013_v41 }
  0x5f   :  { %627 = vmatpush1.bf16.msra.mxu1 %v4016_v42 }
  0x60   :  { %628 = vmatprep.subr.bf16.mxu1 %v4019_v43 }
  0x63   :  { %629 = vmatpush1.bf16.msra.mxu1 %v4022_v44 }
  0x64   :  { %630 = vmatprep.subr.bf16.mxu1 %v4025_v45 }
  0x67   :  { %631 = vmatpush1.bf16.msra.mxu1 %v4028_v46 }
  0x68   :  { %927 = vmatprep.subr.bf16.mxu1 %v3956_v29 }
  0x6a   :  { %649 = vmatmul.mubr.bf16.vlgmr.msra.gmra.mrb[20].mxu1 %v3795_v34 }
  0x6b   :  { %928 = vmatpush1.bf16.msra.mxu1 %v3964_v30  ;;  %959 = vmatprep.mubr.bf16.mxu1 %v4508_v31 }
  0x6c   :  { %929 = vmatprep.subr.bf16.mxu1 %v3968_v32 }
  0x6f   :  { %930 = vmatpush1.bf16.msra.mxu1 %v3975_v33 }
  0x70   :  { %931 = vmatprep.subr.bf16.mxu1 %v3979_v35 }
  0x73   :  { %932 = vmatpush1.bf16.msra.mxu1 %v3990_v36 }
  0x74   :  { %933 = vmatprep.subr.bf16.mxu1 %v3993_v37 }
  0x77   :  { %934 = vmatpush1.bf16.msra.mxu1 %v4000_v38 }
  0x78   :  { %935 = vmatprep.subr.bf16.mxu1 %v4003_v39 }
  0x7b   :  { %936 = vmatpush1.bf16.msra.mxu1 %v4010_v40 }
  0x7c   :  { %937 = vmatprep.subr.bf16.mxu1 %v4013_v41 }
  0x7f   :  { %938 = vmatpush1.bf16.msra.mxu1 %v4016_v42 }
  0x80   :  { %939 = vmatprep.subr.bf16.mxu1 %v4019_v43 }
  0x83   :  { %940 = vmatpush1.bf16.msra.mxu1 %v4022_v44 }
  0x84   :  { %941 = vmatprep.subr.bf16.mxu1 %v4025_v45 }
  0x87   :  { %942 = vmatpush1.bf16.msra.mxu1 %v4028_v46 }
  0x88   :  { %1239 = vmatprep.subr.bf16.mxu1 %v3956_v29 }
  0xfd   :  { %v294_v47 = vpop.f32.mrb[0].mxu1 }
  0xfe   :  { %v296_v48 = vpop.f32.mrb[1].mxu1 }
 0x101   :  { %v4050_v49 = vpop.f32.mrb[2].mxu1 }
 0x102   :  { %v4052_v50 = vpop.f32.mrb[3].mxu1 }
 0x103   :  { %v181_v55 = vpop.f32.mrb[0].mxu0 }
 0x104   :  { %v183_v56 = vpop.f32.mrb[1].mxu0 }
 0x105   :  { %v4054_v51 = vpop.f32.mrb[4].mxu1 }
 0x106   :  { %v4056_v52 = vpop.f32.mrb[5].mxu1 }
 0x107   :  { %v4066_v59 = vpop.f32.mrb[2].mxu0 }
 0x108   :  { %v4068_v60 = vpop.f32.mrb[3].mxu0 }
 0x109   :  { %v4058_v53 = vpop.f32.mrb[6].mxu1 }
 0x10a   :  { %v4060_v54 = vpop.f32.mrb[7].mxu1 }
 0x10b   :  { %v4074_v63 = vpop.f32.mrb[4].mxu0 }
 0x10c   :  { %v4076_v0 = vpop.f32.mrb[5].mxu0 }
 0x10d   :  { %v4062_v57 = vpop.f32.mrb[8].mxu1 }
 0x10e   :  { %4510 = vst [vmem:[#allocation15_spill] sm:$0xff] %v4062_v57  ;;  %v4064_v58 = vpop.f32.mrb[9].mxu1 }
 0x10f   :  { %4511 = vst [vmem:[#allocation16_spill] sm:$0xff] %v4064_v58  ;;  %v4082_v3 = vpop.f32.mrb[6].mxu0 }
 0x110   :  { %v4084_v7 = vpop.f32.mrb[7].mxu0 }
 0x111   :  { %v4070_v61 = vpop.f32.mrb[10].mxu1 }
 0x112   :  { %4512 = vst [vmem:[#allocation17_spill] sm:$0xff] %v4070_v61  ;;  %v4072_v62 = vpop.f32.mrb[11].mxu1 }
 0x113   :  { %4513 = vst [vmem:[#allocation18_spill] sm:$0xff] %v4072_v62  ;;  %v4090_v16 = vpop.f32.mrb[8].mxu0 }
 0x114   :  { %4518 = vst [vmem:[#allocation23_spill] sm:$0xff] %v4090_v16  ;;  %v4092_v17 = vpop.f32.mrb[9].mxu0 }
 0x115   :  { %v4078_v1 = vpop.f32.mrb[12].mxu1  ;;  %4519 = vst [vmem:[#allocation24_spill] sm:$0xff] %v4092_v17 }
 0x116   :  { %4514 = vst [vmem:[#allocation19_spill] sm:$0xff] %v4078_v1  ;;  %v4080_v2 = vpop.f32.mrb[13].mxu1 }
 0x117   :  { %4515 = vst [vmem:[#allocation20_spill] sm:$0xff] %v4080_v2 }
 0x118   :  { %v4094_v31 = vpop.f32.mrb[10].mxu0 }
 0x119   :  { %v4086_v10 = vpop.f32.mrb[14].mxu1  ;;  %4520 = vst [vmem:[#allocation25_spill] sm:$0xff] %v4094_v31  ;;  %v4096_v1 = vpop.f32.mrb[11].mxu0 }
 0x11a   :  { %4516 = vst [vmem:[#allocation21_spill] sm:$0xff] %v4086_v10  ;;  %v4088_v13 = vpop.f32.mrb[15].mxu1  ;;  %4521 = vst [vmem:[#allocation26_spill] sm:$0xff] %v4096_v1 }
 0x11b   :  { %4517 = vst [vmem:[#allocation22_spill] sm:$0xff] %v4088_v13 }
 0x11c   :  { %v4098_v62 = vpop.f32.mrb[12].mxu0 }
 0x11d   :  { %v609_v18 = vpop.f32.mrb[16].mxu1  ;;  %4522 = vst [vmem:[#allocation27_spill] sm:$0xff] %v4098_v62  ;;  %v4100_v61 = vpop.f32.mrb[13].mxu0 }
 0x11e   :  { %v657_v21 = vadd.f32 %v609_v18, %v181_v55  ;;  %v611_v24 = vpop.f32.mrb[17].mxu1  ;;  %4523 = vst [vmem:[#allocation28_spill] sm:$0xff] %v4100_v61 }
 0x11f   :  { %v658_v27 = vadd.f32 %v611_v24, %v183_v56  ;;  %v613_v34 = vpop.f32.mrb[18].mxu1 }
 0x120   :  { %v614_v2 = vpop.f32.mrb[19].mxu1  ;;  %v4102_v10 = vpop.f32.mrb[14].mxu0  ;;  %v3143_v17 = vmul.f32 -1.442695, %v657_v21 }
 0x121   :  { %4524 = vst [vmem:[#allocation29_spill] sm:$0xff] %v4102_v10  ;;  %v4104_v13 = vpop.f32.mrb[15].mxu0  ;;  %v3144_v58 = vmul.f32 -1.442695, %v658_v27 }
 0x122   :  { %4525 = vst [vmem:[#allocation30_spill] sm:$0xff] %v4104_v13 }
 0x123   :  { %3589 = vpow2.f32 %v3144_v58 }
 0x124   :  { %3591 = vpow2.f32 %v3143_v17 }
 0x12d   :  { %v3590_v55 = vpop.eup %3589 }
 0x12e   :  { %v3592_v56 = vpop.eup %3591  ;;  %v671_v18 = vadd.f32 1.0, %v3590_v55 }
 0x12f   :  { %v670_v24 = vadd.f32 1.0, %v3592_v56 }
 0x130   :  { %3593 = vrcp.f32 %v671_v18 }
 0x131   :  { %3595 = vrcp.f32 %v670_v24 }
 0x13a   :  { %v3594_v13 = vpop.eup %3593 }
 0x13b   :  { %v3596_v27 = vpop.eup %3595  ;;  %v680_v17 = vmul.f32 0.0, %v3594_v13 }
 0x13d   :  { %v650_v34 = vpop.f32.mrb[20].mxu1 }
 0x13e   :  { %v659_v2 = vadd.f32 %v650_v34, %v294_v47  ;;  %v652_v31 = vpop.f32.mrb[21].mxu1 }
 0x13f   :  { %v660_v1 = vadd.f32 %v652_v31, %v296_v48  ;;  %v654_v62 = vpop.f32.mrb[22].mxu1 }
 0x140   :  { %v3145_v61 = vmul.f32 -1.442695, %v659_v2  ;;  %v655_v57 = vpop.f32.mrb[23].mxu1 }
 0x141   :  { %3597 = vtanh.f32 %v660_v1 }
 0x142   :  { %3599 = vpow2.f32 %v3145_v61  ;;  %v4526_v61 = vmov 0  }
 0x14b   :  { %v3598_v21 = vpop.eup %3597 }
 0x14c   :  { %v3600_v58 = vpop.eup %3599  ;;  %v681_v10 = vmul.f32 %v3598_v21, %v3596_v27 }
 0x14d   :  { %v672_v16 = vadd.f32 1.0, %v3600_v58 }
 0x14e   :  { %v4106_v55 = vadd.f32 %v681_v10, %v680_v17 }
 0x14f   :  { %3601 = vrcp.f32 %v672_v16 }
 0x150   :  { %3603 = vtanh.f32 %v4106_v55 }
 0x159   :  { %v3602_v47 = vpop.eup %3601 }
 0x15a   :  { %v3604_v31 = vpop.eup %3603 }
 0x15b   :  { %v4109_v48 = vmul.f32 %v3604_v31, %v3602_v47 }
 0x15d   :  { %v693_v57 = vpack.c.bf16 %v4109_v48, %v4109_v48 }
 0x15f   :  { %919 = vmatmul.mubr.bf16.vlgmr.msra.gmra.mrb[16].mxu0 %v693_v57  ;;  %960 = vmatmul.mubr.bf16.vlgmr.msra.gmra.mrb[24].mxu1 %v693_v57 }
 0x160   :  { %1199 = vmatpush1.bf16.msra.mxu0 %v3865_v4  ;;  %1240 = vmatpush1.bf16.msra.mxu1 %v3964_v30 }
 0x161   :  { %1200 = vmatprep.subr.bf16.mxu0 %v3870_v6  ;;  %1241 = vmatprep.subr.bf16.mxu1 %v3968_v32 }
 0x162   :  { %1230 = vmatprep.mubr.bf16.mxu0 %v4526_v61  ;;  %1271 = vmatprep.mubr.bf16.mxu1 %v4526_v61 }
 0x164   :  { %1201 = vmatpush1.bf16.msra.mxu0 %v3878_v8  ;;  %1242 = vmatpush1.bf16.msra.mxu1 %v3975_v33 }
 0x165   :  { %1202 = vmatprep.subr.bf16.mxu0 %v3881_v9  ;;  %1243 = vmatprep.subr.bf16.mxu1 %v3979_v35 }
 0x168   :  { %1203 = vmatpush1.bf16.msra.mxu0 %v3889_v11  ;;  %1244 = vmatpush1.bf16.msra.mxu1 %v3990_v36 }
 0x169   :  { %1204 = vmatprep.subr.bf16.mxu0 %v3892_v12  ;;  %1245 = vmatprep.subr.bf16.mxu1 %v3993_v37 }
 0x16c   :  { %1205 = vmatpush1.bf16.msra.mxu0 %v3900_v14  ;;  %1246 = vmatpush1.bf16.msra.mxu1 %v4000_v38 }
 0x16d   :  { %1206 = vmatprep.subr.bf16.mxu0 %v3902_v15  ;;  %1247 = vmatprep.subr.bf16.mxu1 %v4003_v39 }
 0x170   :  { %1207 = vmatpush1.bf16.msra.mxu0 %v3911_v19  ;;  %1248 = vmatpush1.bf16.msra.mxu1 %v4010_v40 }
 0x171   :  { %1208 = vmatprep.subr.bf16.mxu0 %v3915_v20  ;;  %1249 = vmatprep.subr.bf16.mxu1 %v4013_v41 }
 0x174   :  { %1209 = vmatpush1.bf16.msra.mxu0 %v3926_v22  ;;  %1250 = vmatpush1.bf16.msra.mxu1 %v4016_v42 }
 0x175   :  { %1210 = vmatprep.subr.bf16.mxu0 %v3930_v23  ;;  %1251 = vmatprep.subr.bf16.mxu1 %v4019_v43 }
 0x178   :  { %1211 = vmatpush1.bf16.msra.mxu0 %v3939_v25  ;;  %1252 = vmatpush1.bf16.msra.mxu1 %v4022_v44 }
 0x179   :  { %1212 = vmatprep.subr.bf16.mxu0 %v3943_v26  ;;  %1253 = vmatprep.subr.bf16.mxu1 %v4025_v45 }
 0x17c   :  { %1213 = vmatpush1.bf16.msra.mxu0 %v3952_v28  ;;  %1254 = vmatpush1.bf16.msra.mxu1 %v4028_v46 }
 0x17d   :  { %1510 = vmatprep.subr.bf16.mxu0 %v3867_v5  ;;  %1551 = vmatprep.subr.bf16.mxu1 %v3956_v29 }
 0x232   :  { %v920_v62 = vpop.f32.mrb[16].mxu0  ;;  %v961_v1 = vpop.f32.mrb[24].mxu1 }
 0x233   :  { %v968_v10 = vadd.f32 %v920_v62, %v4066_v59  ;;  %v970_v13 = vadd.f32 %v961_v1, %v4050_v49  ;;  %v922_v16 = vpop.f32.mrb[17].mxu0  ;;  %v963_v56 = vpop.f32.mrb[25].mxu1 }
 0x234   :  { %v969_v18 = vadd.f32 %v922_v16, %v4068_v60  ;;  %v971_v24 = vadd.f32 %v963_v56, %v4052_v50  ;;  %v924_v34 = vpop.f32.mrb[18].mxu0  ;;  %v965_v2 = vpop.f32.mrb[26].mxu1 }
 0x235   :  { %v3178_v27 = vmul.f32 -1.442695, %v968_v10  ;;  %v925_v21 = vpop.f32.mrb[19].mxu0  ;;  %v966_v58 = vpop.f32.mrb[27].mxu1  ;;  %v3180_v29 = vmul.f32 -1.442695, %v970_v13 }
 0x236   :  { %v3179_v5 = vmul.f32 -1.442695, %v969_v18  ;;  %v4217_v34 = vld [vmem:[#allocation9 + $0x24] ss:$16 sps:$4 sm:$0xff]   ;;  %v4219_v2 = vld [vmem:[#allocation9 + $0x2c] ss:$16 sps:$4 sm:$0xff]  }
 0x237   :  { %3605 = vpow2.f32 %v3178_v27  ;;  %v4221_v27 = vld [vmem:[#allocation9 + $0x20] ss:$16 sps:$4 sm:$0xff]   ;;  %v4223_v21 = vld [vmem:[#allocation9 + $0x28] ss:$16 sps:$4 sm:$0xff]   ;;  %v4229_v58 = vld [vmem:[#allocation9 + $0x44] ss:$16 sps:$4 sm:$0xff]  }
 0x238   :  { %3607 = vpow2.f32 %v3179_v5  ;;  %v4231_v5 = vld [vmem:[#allocation9 + $0x4c] ss:$16 sps:$4 sm:$0xff]  }
 0x239   :  { %3609 = vtanh.f32 %v971_v24 }
 0x23a   :  { %3611 = vpow2.f32 %v3180_v29  ;;  %v4233_v29 = vld [vmem:[#allocation9 + $0x40] ss:$16 sps:$4 sm:$0xff]  }
 0x241   :  { %v3606_v17 = vpop.eup %3605 }
 0x242   :  { %v981_v47 = vadd.f32 1.0, %v3606_v17  ;;  %v3608_v59 = vpop.eup %3607  ;;  %v4235_v17 = vld [vmem:[#allocation9 + $0x48] ss:$16 sps:$4 sm:$0xff]  }
 0x243   :  { %v982_v49 = vadd.f32 1.0, %v3608_v59  ;;  %v3610_v60 = vpop.eup %3609  ;;  %v4243_v59 = vld [vmem:[#allocation9 + $0x6c] ss:$16 sps:$4 sm:$0xff]  }
 0x244   :  { %3613 = vrcp.f32 %v981_v47  ;;  %v3612_v31 = vpop.eup %3611  ;;  %v4241_v47 = vld [vmem:[#allocation9 + $0x64] ss:$16 sps:$4 sm:$0xff]  }
 0x245   :  { %3615 = vrcp.f32 %v982_v49  ;;  %v983_v1 = vadd.f32 1.0, %v3612_v31  ;;  %v4245_v49 = vld [vmem:[#allocation9 + $0x60] ss:$16 sps:$4 sm:$0xff]   ;;  %v4253_v31 = vld [vmem:[#allocation9 + $0x84] ss:$16 sps:$4 sm:$0xff]  }
 0x247   :  { %3617 = vrcp.f32 %v983_v1  ;;  %v4265_v1 = vld [vmem:[#allocation9 + $0xa0] ss:$16 sps:$4 sm:$0xff]  }
 0x24e   :  { %v3614_v50 = vpop.eup %3613 }
 0x24f   :  { %v992_v57 = vmul.f32 %v3614_v50, %v3610_v60  ;;  %v3616_v62 = vpop.eup %3615  ;;  %v4247_v60 = vld [vmem:[#allocation9 + $0x68] ss:$16 sps:$4 sm:$0xff]   ;;  %v4255_v50 = vld [vmem:[#allocation9 + $0x8c] ss:$16 sps:$4 sm:$0xff]  }
 0x250   :  { %v991_v10 = vmul.f32 %v3616_v62, %v4106_v55  ;;  %v4211_v55 = vld [vmem:[#allocation9 + $0x8] ss:$16 sps:$4 sm:$0xff]  }
 0x251   :  { %v3618_v13 = vpop.eup %3617  ;;  %v4259_v62 = vld [vmem:[#allocation9 + $0x88] ss:$16 sps:$4 sm:$0xff]  }
 0x252   :  { %v4152_v16 = vadd.f32 %v992_v57, %v991_v10  ;;  %v4257_v57 = vld [vmem:[#allocation9 + $0x80] ss:$16 sps:$4 sm:$0xff]   ;;  %v4267_v10 = vld [vmem:[#allocation9 + $0xa4] ss:$16 sps:$4 sm:$0xff]  }
 0x254   :  { %3619 = vtanh.f32 %v4152_v16 }
 0x25e   :  { %v3620_v56 = vpop.eup %3619 }
 0x25f   :  { %v4155_v18 = vmul.f32 %v3620_v56, %v3618_v13  ;;  %v4271_v13 = vld [vmem:[#allocation9 + $0xac] ss:$16 sps:$4 sm:$0xff]   ;;  %v4273_v56 = vld [vmem:[#allocation9 + $0xc4] ss:$16 sps:$4 sm:$0xff]  }
 0x261   :  { %v1005_v24 = vpack.c.bf16 %v4155_v18, %v4155_v18 }
 0x263   :  { %1231 = vmatmul.mubr.bf16.vlgmr.msra.gmra.mrb[20].mxu0 %v1005_v24  ;;  %1272 = vmatmul.mubr.bf16.vlgmr.msra.gmra.mrb[28].mxu1 %v1005_v24  ;;  %v4276_v24 = vld [vmem:[#allocation9 + $0xcc] ss:$16 sps:$4 sm:$0xff]  }
 0x264   :  { %1511 = vmatpush1.bf16.msra.mxu0 %v3865_v4  ;;  %1552 = vmatpush1.bf16.msra.mxu1 %v3964_v30 }
 0x265   :  { %1512 = vmatprep.subr.bf16.mxu0 %v3870_v6  ;;  %1553 = vmatprep.subr.bf16.mxu1 %v3968_v32 }
 0x266   :  { %1542 = vmatprep.mubr.bf16.mxu0 %v4526_v61  ;;  %1583 = vmatprep.mubr.bf16.mxu1 %v4526_v61 }
 0x268   :  { %1513 = vmatpush1.bf16.msra.mxu0 %v3878_v8  ;;  %1554 = vmatpush1.bf16.msra.mxu1 %v3975_v33 }
 0x269   :  { %1514 = vmatprep.subr.bf16.mxu0 %v3881_v9  ;;  %1555 = vmatprep.subr.bf16.mxu1 %v3979_v35 }
 0x26c   :  { %1515 = vmatpush1.bf16.msra.mxu0 %v3889_v11  ;;  %1556 = vmatpush1.bf16.msra.mxu1 %v3990_v36 }
 0x26d   :  { %1516 = vmatprep.subr.bf16.mxu0 %v3892_v12  ;;  %1557 = vmatprep.subr.bf16.mxu1 %v3993_v37 }
 0x270   :  { %1517 = vmatpush1.bf16.msra.mxu0 %v3900_v14  ;;  %1558 = vmatpush1.bf16.msra.mxu1 %v4000_v38 }
 0x271   :  { %1518 = vmatprep.subr.bf16.mxu0 %v3902_v15  ;;  %1559 = vmatprep.subr.bf16.mxu1 %v4003_v39 }
 0x274   :  { %1519 = vmatpush1.bf16.msra.mxu0 %v3911_v19  ;;  %1560 = vmatpush1.bf16.msra.mxu1 %v4010_v40 }
 0x275   :  { %1520 = vmatprep.subr.bf16.mxu0 %v3915_v20  ;;  %1561 = vmatprep.subr.bf16.mxu1 %v4013_v41 }
 0x278   :  { %1521 = vmatpush1.bf16.msra.mxu0 %v3926_v22  ;;  %1562 = vmatpush1.bf16.msra.mxu1 %v4016_v42 }
 0x279   :  { %1522 = vmatprep.subr.bf16.mxu0 %v3930_v23  ;;  %1563 = vmatprep.subr.bf16.mxu1 %v4019_v43 }
 0x27c   :  { %1523 = vmatpush1.bf16.msra.mxu0 %v3939_v25  ;;  %1564 = vmatpush1.bf16.msra.mxu1 %v4022_v44 }
 0x27d   :  { %1524 = vmatprep.subr.bf16.mxu0 %v3943_v26  ;;  %1565 = vmatprep.subr.bf16.mxu1 %v4025_v45 }
 0x280   :  { %1525 = vmatpush1.bf16.msra.mxu0 %v3952_v28  ;;  %1566 = vmatpush1.bf16.msra.mxu1 %v4028_v46 }
 0x336   :  { %v1232_v4 = vpop.f32.mrb[20].mxu0  ;;  %v1273_v6 = vpop.f32.mrb[28].mxu1 }
 0x337   :  { %v1280_v8 = vadd.f32 %v1232_v4, %v4074_v63  ;;  %v1282_v9 = vadd.f32 %v1273_v6, %v4054_v51  ;;  %v1234_v11 = vpop.f32.mrb[21].mxu0  ;;  %v1275_v12 = vpop.f32.mrb[29].mxu1  ;;  %v4207_v63 = vld [vmem:[#allocation9 + $0xc] ss:$16 sps:$4 sm:$0xff]   ;;  %v4281_v4 = vld [vmem:[#allocation9 + $0xc0] ss:$16 sps:$4 sm:$0xff]  }
 0x338   :  { %v1281_v14 = vadd.f32 %v1234_v11, %v4076_v0  ;;  %v1283_v15 = vadd.f32 %v1275_v12, %v4056_v52  ;;  %v1236_v19 = vpop.f32.mrb[22].mxu0  ;;  %v1277_v20 = vpop.f32.mrb[30].mxu1  ;;  %v4205_v52 = vld [vmem:[#allocation9 + $0x4] ss:$16 sps:$4 sm:$0xff]   ;;  %v4209_v0 = vld [vmem:[#allocation9] ss:$16 sps:$4 sm:$0xff]   ;;  %1863 = vmatprep.subr.bf16.mxu1 %v4207_v63 }
 0x339   :  { %v3213_v22 = vmul.f32 -1.442695, %v1280_v8  ;;  %v1237_v23 = vpop.f32.mrb[23].mxu0  ;;  %v1278_v25 = vpop.f32.mrb[31].mxu1  ;;  %v3215_v28 = vmul.f32 -1.442695, %v1282_v9  ;;  %1822 = vmatprep.subr.bf16.mxu0 %v4205_v52 }
 0x33a   :  { %v3214_v26 = vmul.f32 -1.442695, %v1281_v14  ;;  %v4283_v6 = vld [vmem:[#allocation9 + $0xc8] ss:$16 sps:$4 sm:$0xff]   ;;  %v4287_v8 = vld [vmem:[#allocation9 + $0xe4] ss:$16 sps:$4 sm:$0xff]  }
 0x33b   :  { %3621 = vpow2.f32 %v3213_v22  ;;  %v4289_v9 = vld [vmem:[#allocation9 + $0xec] ss:$16 sps:$4 sm:$0xff]   ;;  %v4293_v11 = vld [vmem:[#allocation9 + $0xe0] ss:$16 sps:$4 sm:$0xff]   ;;  %v4295_v12 = vld [vmem:[#allocation9 + $0xe8] ss:$16 sps:$4 sm:$0xff]  }
 0x33c   :  { %3623 = vpow2.f32 %v3214_v26 }
 0x33d   :  { %3625 = vtanh.f32 %v1283_v15 }
 0x33e   :  { %3627 = vpow2.f32 %v3215_v28 }
 0x345   :  { %v3622_v30 = vpop.eup %3621 }
 0x346   :  { %v1293_v32 = vadd.f32 1.0, %v3622_v30  ;;  %v3624_v33 = vpop.eup %3623 }
 0x347   :  { %v1294_v35 = vadd.f32 1.0, %v3624_v33  ;;  %v3626_v36 = vpop.eup %3625 }
 0x348   :  { %3629 = vrcp.f32 %v1293_v32  ;;  %v3628_v37 = vpop.eup %3627 }
 0x349   :  { %3631 = vrcp.f32 %v1294_v35  ;;  %v1295_v41 = vadd.f32 1.0, %v3628_v37 }
 0x34b   :  { %3633 = vrcp.f32 %v1295_v41 }
 0x352   :  { %v3630_v38 = vpop.eup %3629 }
 0x353   :  { %v1304_v39 = vmul.f32 %v3630_v38, %v3626_v36  ;;  %v3632_v40 = vpop.eup %3631 }
 0x354   :  { %v1303_v42 = vmul.f32 %v3632_v40, %v4152_v16  ;;  %v4269_v16 = vld [vmem:[#allocation9 + $0xa8] ss:$16 sps:$4 sm:$0xff]  }
 0x355   :  { %v3634_v44 = vpop.eup %3633 }
 0x356   :  { %v4196_v43 = vadd.f32 %v1304_v39, %v1303_v42 }
 0x358   :  { %3635 = vtanh.f32 %v4196_v43 }
 0x362   :  { %v3636_v45 = vpop.eup %3635 }
 0x363   :  { %v4199_v46 = vmul.f32 %v3636_v45, %v3634_v44 }
 0x365   :  { %v1317_v51 = vpack.c.bf16 %v4199_v46, %v4199_v46 }
 0x367   :  { %1543 = vmatmul.mubr.bf16.vlgmr.msra.gmra.mrb[24].mxu0 %v1317_v51  ;;  %1584 = vmatmul.mubr.bf16.vlgmr.msra.gmra.mrb[32].mxu1 %v1317_v51 }
 0x368   :  { %1854 = vmatprep.mubr.bf16.mxu0 %v4526_v61  ;;  %1895 = vmatprep.mubr.bf16.mxu1 %v4526_v61 }
 0x369   :  { %1823 = vmatpush1.bf16.msra.mxu0 %v4209_v0  ;;  %1864 = vmatpush1.bf16.msra.mxu1 %v4211_v55 }
 0x36a   :  { %1824 = vmatprep.subr.bf16.mxu0 %v4217_v34  ;;  %1865 = vmatprep.subr.bf16.mxu1 %v4219_v2 }
 0x36d   :  { %1825 = vmatpush1.bf16.msra.mxu0 %v4221_v27  ;;  %1866 = vmatpush1.bf16.msra.mxu1 %v4223_v21 }
 0x36e   :  { %1826 = vmatprep.subr.bf16.mxu0 %v4229_v58  ;;  %1867 = vmatprep.subr.bf16.mxu1 %v4231_v5 }
 0x371   :  { %1827 = vmatpush1.bf16.msra.mxu0 %v4233_v29  ;;  %1868 = vmatpush1.bf16.msra.mxu1 %v4235_v17 }
 0x372   :  { %1828 = vmatprep.subr.bf16.mxu0 %v4241_v47  ;;  %1869 = vmatprep.subr.bf16.mxu1 %v4243_v59 }
 0x375   :  { %1829 = vmatpush1.bf16.msra.mxu0 %v4245_v49  ;;  %1870 = vmatpush1.bf16.msra.mxu1 %v4247_v60 }
 0x376   :  { %1830 = vmatprep.subr.bf16.mxu0 %v4253_v31  ;;  %1871 = vmatprep.subr.bf16.mxu1 %v4255_v50 }
 0x379   :  { %1831 = vmatpush1.bf16.msra.mxu0 %v4257_v57  ;;  %1872 = vmatpush1.bf16.msra.mxu1 %v4259_v62 }
 0x37a   :  { %1832 = vmatprep.subr.bf16.mxu0 %v4267_v10  ;;  %1873 = vmatprep.subr.bf16.mxu1 %v4271_v13 }
 0x37d   :  { %1833 = vmatpush1.bf16.msra.mxu0 %v4265_v1  ;;  %1874 = vmatpush1.bf16.msra.mxu1 %v4269_v16 }
 0x37e   :  { %1834 = vmatprep.subr.bf16.mxu0 %v4273_v56  ;;  %1875 = vmatprep.subr.bf16.mxu1 %v4276_v24 }
 0x381   :  { %1835 = vmatpush1.bf16.msra.mxu0 %v4281_v4  ;;  %1876 = vmatpush1.bf16.msra.mxu1 %v4283_v6 }
 0x382   :  { %1836 = vmatprep.subr.bf16.mxu0 %v4287_v8  ;;  %1877 = vmatprep.subr.bf16.mxu1 %v4289_v9 }
 0x385   :  { %1837 = vmatpush1.bf16.msra.mxu0 %v4293_v11  ;;  %1878 = vmatpush1.bf16.msra.mxu1 %v4295_v12 }
 0x386   :  { %2134 = vmatprep.subr.bf16.mxu0 %v4205_v52  ;;  %2175 = vmatprep.subr.bf16.mxu1 %v4207_v63 }
 0x43a   :  { %v1544_v14 = vpop.f32.mrb[24].mxu0  ;;  %v1585_v15 = vpop.f32.mrb[32].mxu1 }
 0x43b   :  { %v1592_v19 = vadd.f32 %v1544_v14, %v4082_v3  ;;  %v1594_v20 = vadd.f32 %v1585_v15, %v4058_v53  ;;  %v1546_v22 = vpop.f32.mrb[25].mxu0  ;;  %v1587_v23 = vpop.f32.mrb[33].mxu1 }
 0x43c   :  { %v1593_v25 = vadd.f32 %v1546_v22, %v4084_v7  ;;  %v1595_v26 = vadd.f32 %v1587_v23, %v4060_v54  ;;  %v1548_v28 = vpop.f32.mrb[26].mxu0  ;;  %v1589_v30 = vpop.f32.mrb[34].mxu1  ;;  %v4527_v23 = vld [vmem:[#allocation23_spill] sm:$0xff] }
 0x43d   :  { %v3248_v32 = vmul.f32 -1.442695, %v1592_v19  ;;  %v1549_v33 = vpop.f32.mrb[27].mxu0  ;;  %v1590_v35 = vpop.f32.mrb[35].mxu1  ;;  %v3250_v37 = vmul.f32 -1.442695, %v1594_v20 }
 0x43e   :  { %v3249_v36 = vmul.f32 -1.442695, %v1593_v25  ;;  %v4529_v33 = vld [vmem:[#allocation24_spill] sm:$0xff] }
 0x43f   :  { %3637 = vpow2.f32 %v3248_v32 }
 0x440   :  { %3639 = vpow2.f32 %v3249_v36  ;;  %v4530_v36 = vld [vmem:[#allocation16_spill] sm:$0xff] }
 0x441   :  { %3641 = vtanh.f32 %v1595_v26  ;;  %v4528_v26 = vld [vmem:[#allocation15_spill] sm:$0xff] }
 0x442   :  { %3643 = vpow2.f32 %v3250_v37 }
 0x449   :  { %v3638_v38 = vpop.eup %3637 }
 0x44a   :  { %v1605_v39 = vadd.f32 1.0, %v3638_v38  ;;  %v3640_v3 = vpop.eup %3639 }
 0x44b   :  { %v1606_v53 = vadd.f32 1.0, %v3640_v3  ;;  %v3642_v7 = vpop.eup %3641 }
 0x44c   :  { %3645 = vrcp.f32 %v1605_v39  ;;  %v3644_v40 = vpop.eup %3643 }
 0x44d   :  { %3647 = vrcp.f32 %v1606_v53  ;;  %v1607_v44 = vadd.f32 1.0, %v3644_v40 }
 0x44f   :  { %3649 = vrcp.f32 %v1607_v44 }
 0x456   :  { %v3646_v54 = vpop.eup %3645 }
 0x457   :  { %v1616_v41 = vmul.f32 %v3646_v54, %v3642_v7  ;;  %v3648_v42 = vpop.eup %3647 }
 0x458   :  { %v1615_v45 = vmul.f32 %v3648_v42, %v4196_v43 }
 0x459   :  { %v3650_v14 = vpop.eup %3649 }
 0x45a   :  { %v4308_v51 = vadd.f32 %v1616_v41, %v1615_v45 }
 0x45c   :  { %3651 = vtanh.f32 %v4308_v51 }
 0x466   :  { %v3652_v15 = vpop.eup %3651 }
 0x467   :  { %v4311_v19 = vmul.f32 %v3652_v15, %v3650_v14 }
 0x469   :  { %v1629_v20 = vpack.c.bf16 %v4311_v19, %v4311_v19 }
 0x46b   :  { %1855 = vmatmul.mubr.bf16.vlgmr.msra.gmra.mrb[28].mxu0 %v1629_v20  ;;  %1896 = vmatmul.mubr.bf16.vlgmr.msra.gmra.mrb[36].mxu1 %v1629_v20 }
 0x46c   :  { %2135 = vmatpush1.bf16.msra.mxu0 %v4209_v0  ;;  %2176 = vmatpush1.bf16.msra.mxu1 %v4211_v55 }
 0x46d   :  { %2136 = vmatprep.subr.bf16.mxu0 %v4217_v34  ;;  %2177 = vmatprep.subr.bf16.mxu1 %v4219_v2 }
 0x46e   :  { %2166 = vmatprep.mubr.bf16.mxu0 %v4526_v61  ;;  %2207 = vmatprep.mubr.bf16.mxu1 %v4526_v61 }
 0x470   :  { %2137 = vmatpush1.bf16.msra.mxu0 %v4221_v27  ;;  %2178 = vmatpush1.bf16.msra.mxu1 %v4223_v21 }
 0x471   :  { %2138 = vmatprep.subr.bf16.mxu0 %v4229_v58  ;;  %2179 = vmatprep.subr.bf16.mxu1 %v4231_v5 }
 0x474   :  { %2139 = vmatpush1.bf16.msra.mxu0 %v4233_v29  ;;  %2180 = vmatpush1.bf16.msra.mxu1 %v4235_v17 }
 0x475   :  { %2140 = vmatprep.subr.bf16.mxu0 %v4241_v47  ;;  %2181 = vmatprep.subr.bf16.mxu1 %v4243_v59 }
 0x478   :  { %2141 = vmatpush1.bf16.msra.mxu0 %v4245_v49  ;;  %2182 = vmatpush1.bf16.msra.mxu1 %v4247_v60 }
 0x479   :  { %2142 = vmatprep.subr.bf16.mxu0 %v4253_v31  ;;  %2183 = vmatprep.subr.bf16.mxu1 %v4255_v50 }
 0x47c   :  { %2143 = vmatpush1.bf16.msra.mxu0 %v4257_v57  ;;  %2184 = vmatpush1.bf16.msra.mxu1 %v4259_v62 }
 0x47d   :  { %2144 = vmatprep.subr.bf16.mxu0 %v4267_v10  ;;  %2185 = vmatprep.subr.bf16.mxu1 %v4271_v13 }
 0x480   :  { %2145 = vmatpush1.bf16.msra.mxu0 %v4265_v1  ;;  %2186 = vmatpush1.bf16.msra.mxu1 %v4269_v16 }
 0x481   :  { %2146 = vmatprep.subr.bf16.mxu0 %v4273_v56  ;;  %2187 = vmatprep.subr.bf16.mxu1 %v4276_v24 }
 0x484   :  { %2147 = vmatpush1.bf16.msra.mxu0 %v4281_v4  ;;  %2188 = vmatpush1.bf16.msra.mxu1 %v4283_v6 }
 0x485   :  { %2148 = vmatprep.subr.bf16.mxu0 %v4287_v8  ;;  %2189 = vmatprep.subr.bf16.mxu1 %v4289_v9 }
 0x488   :  { %2149 = vmatpush1.bf16.msra.mxu0 %v4293_v11  ;;  %2190 = vmatpush1.bf16.msra.mxu1 %v4295_v12 }
 0x489   :  { %2446 = vmatprep.subr.bf16.mxu0 %v4205_v52  ;;  %2487 = vmatprep.subr.bf16.mxu1 %v4207_v63 }
 0x53e   :  { %v1856_v43 = vpop.f32.mrb[28].mxu0  ;;  %v1897_v22 = vpop.f32.mrb[36].mxu1 }
 0x53f   :  { %v1904_v25 = vadd.f32 %v1856_v43, %v4527_v23  ;;  %v1906_v28 = vadd.f32 %v1897_v22, %v4528_v26  ;;  %v1858_v30 = vpop.f32.mrb[29].mxu0  ;;  %v1899_v32 = vpop.f32.mrb[37].mxu1 }
 0x540   :  { %v1905_v35 = vadd.f32 %v1858_v30, %v4529_v33  ;;  %v1907_v37 = vadd.f32 %v1899_v32, %v4530_v36  ;;  %v1860_v38 = vpop.f32.mrb[30].mxu0  ;;  %v1901_v39 = vpop.f32.mrb[38].mxu1  ;;  %v4531_v36 = vld [vmem:[#allocation25_spill] sm:$0xff] }
 0x541   :  { %v3283_v3 = vmul.f32 -1.442695, %v1904_v25  ;;  %v1861_v53 = vpop.f32.mrb[31].mxu0  ;;  %v1902_v7 = vpop.f32.mrb[39].mxu1  ;;  %v3285_v54 = vmul.f32 -1.442695, %v1906_v28 }
 0x542   :  { %v3284_v40 = vmul.f32 -1.442695, %v1905_v35  ;;  %v4532_v38 = vld [vmem:[#allocation17_spill] sm:$0xff]  ;;  %v4533_v7 = vld [vmem:[#allocation26_spill] sm:$0xff] }
 0x543   :  { %3653 = vpow2.f32 %v3283_v3 }
 0x544   :  { %3655 = vpow2.f32 %v3284_v40 }
 0x545   :  { %3657 = vtanh.f32 %v1907_v37 }
 0x546   :  { %3659 = vpow2.f32 %v3285_v54  ;;  %v4534_v54 = vld [vmem:[#allocation18_spill] sm:$0xff] }
 0x54d   :  { %v3654_v41 = vpop.eup %3653 }
 0x54e   :  { %v1917_v42 = vadd.f32 1.0, %v3654_v41  ;;  %v3656_v44 = vpop.eup %3655 }
 0x54f   :  { %v1918_v45 = vadd.f32 1.0, %v3656_v44  ;;  %v3658_v14 = vpop.eup %3657 }
 0x550   :  { %3661 = vrcp.f32 %v1917_v42  ;;  %v3660_v15 = vpop.eup %3659 }
 0x551   :  { %3663 = vrcp.f32 %v1918_v45  ;;  %v1919_v23 = vadd.f32 1.0, %v3660_v15 }
 0x553   :  { %3665 = vrcp.f32 %v1919_v23 }
 0x55a   :  { %v3662_v20 = vpop.eup %3661 }
 0x55b   :  { %v1928_v43 = vmul.f32 %v3662_v20, %v3658_v14  ;;  %v3664_v22 = vpop.eup %3663 }
 0x55c   :  { %v1927_v25 = vmul.f32 %v3664_v22, %v4308_v51 }
 0x55d   :  { %v3666_v28 = vpop.eup %3665 }
 0x55e   :  { %v4354_v26 = vadd.f32 %v1928_v43, %v1927_v25 }
 0x560   :  { %3667 = vtanh.f32 %v4354_v26 }
 0x56a   :  { %v3668_v30 = vpop.eup %3667 }
 0x56b   :  { %v4357_v32 = vmul.f32 %v3668_v30, %v3666_v28 }
 0x56d   :  { %v1941_v33 = vpack.c.bf16 %v4357_v32, %v4357_v32 }
 0x56f   :  { %2167 = vmatmul.mubr.bf16.vlgmr.msra.gmra.mrb[32].mxu0 %v1941_v33  ;;  %2208 = vmatmul.mubr.bf16.vlgmr.msra.gmra.mrb[40].mxu1 %v1941_v33 }
 0x570   :  { %2447 = vmatpush1.bf16.msra.mxu0 %v4209_v0  ;;  %2488 = vmatpush1.bf16.msra.mxu1 %v4211_v55 }
 0x571   :  { %2448 = vmatprep.subr.bf16.mxu0 %v4217_v34  ;;  %2489 = vmatprep.subr.bf16.mxu1 %v4219_v2 }
 0x572   :  { %2478 = vmatprep.mubr.bf16.mxu0 %v4526_v61  ;;  %2519 = vmatprep.mubr.bf16.mxu1 %v4526_v61 }
 0x574   :  { %2449 = vmatpush1.bf16.msra.mxu0 %v4221_v27  ;;  %2490 = vmatpush1.bf16.msra.mxu1 %v4223_v21 }
 0x575   :  { %2450 = vmatprep.subr.bf16.mxu0 %v4229_v58  ;;  %2491 = vmatprep.subr.bf16.mxu1 %v4231_v5 }
 0x578   :  { %2451 = vmatpush1.bf16.msra.mxu0 %v4233_v29  ;;  %2492 = vmatpush1.bf16.msra.mxu1 %v4235_v17 }
 0x579   :  { %2452 = vmatprep.subr.bf16.mxu0 %v4241_v47  ;;  %2493 = vmatprep.subr.bf16.mxu1 %v4243_v59 }
 0x57c   :  { %2453 = vmatpush1.bf16.msra.mxu0 %v4245_v49  ;;  %2494 = vmatpush1.bf16.msra.mxu1 %v4247_v60 }
 0x57d   :  { %2454 = vmatprep.subr.bf16.mxu0 %v4253_v31  ;;  %2495 = vmatprep.subr.bf16.mxu1 %v4255_v50 }
 0x580   :  { %2455 = vmatpush1.bf16.msra.mxu0 %v4257_v57  ;;  %2496 = vmatpush1.bf16.msra.mxu1 %v4259_v62 }
 0x581   :  { %2456 = vmatprep.subr.bf16.mxu0 %v4267_v10  ;;  %2497 = vmatprep.subr.bf16.mxu1 %v4271_v13 }
 0x584   :  { %2457 = vmatpush1.bf16.msra.mxu0 %v4265_v1  ;;  %2498 = vmatpush1.bf16.msra.mxu1 %v4269_v16 }
 0x585   :  { %2458 = vmatprep.subr.bf16.mxu0 %v4273_v56  ;;  %2499 = vmatprep.subr.bf16.mxu1 %v4276_v24 }
 0x588   :  { %2459 = vmatpush1.bf16.msra.mxu0 %v4281_v4  ;;  %2500 = vmatpush1.bf16.msra.mxu1 %v4283_v6 }
 0x589   :  { %2460 = vmatprep.subr.bf16.mxu0 %v4287_v8  ;;  %2501 = vmatprep.subr.bf16.mxu1 %v4289_v9 }
 0x58c   :  { %2461 = vmatpush1.bf16.msra.mxu0 %v4293_v11  ;;  %2502 = vmatpush1.bf16.msra.mxu1 %v4295_v12 }
 0x58d   :  { %2758 = vmatprep.subr.bf16.mxu0 %v4205_v52  ;;  %2799 = vmatprep.subr.bf16.mxu1 %v4207_v63 }
 0x642   :  { %v2168_v51 = vpop.f32.mrb[32].mxu0  ;;  %v2209_v35 = vpop.f32.mrb[40].mxu1 }
 0x643   :  { %v2216_v37 = vadd.f32 %v2168_v51, %v4531_v36  ;;  %v2218_v39 = vadd.f32 %v2209_v35, %v4532_v38  ;;  %v2170_v3 = vpop.f32.mrb[33].mxu0  ;;  %v2211_v53 = vpop.f32.mrb[41].mxu1 }
 0x644   :  { %v2217_v40 = vadd.f32 %v2170_v3, %v4533_v7  ;;  %v2219_v41 = vadd.f32 %v2211_v53, %v4534_v54  ;;  %v2172_v42 = vpop.f32.mrb[34].mxu0  ;;  %v2213_v44 = vpop.f32.mrb[42].mxu1 }
 0x645   :  { %v3318_v45 = vmul.f32 -1.442695, %v2216_v37  ;;  %v2173_v14 = vpop.f32.mrb[35].mxu0  ;;  %v2214_v15 = vpop.f32.mrb[43].mxu1  ;;  %v3320_v63 = vmul.f32 -1.442695, %v2218_v39  ;;  %v2880_v44 = vpack.c.bf16 %v4155_v18, %v4109_v48 }
 0x646   :  { %v3319_v52 = vmul.f32 -1.442695, %v2217_v40  ;;  %v3582_v42 = vld [vmem:[%s4505_s3 + $0x8] sm:$0xff]   ;;  %v3584_v14 = vld [vmem:[%s4505_s3 + $0x18] sm:$0xff]   ;;  %v3585_v48 = vld [vmem:[%s4505_s3 + $0x20] sm:$0xff]  }
 0x647   :  { %3669 = vpow2.f32 %v3318_v45  ;;  %v3583_v45 = vld [vmem:[%s4505_s3 + $0x10] sm:$0xff]   ;;  %v3586_v18 = vld [vmem:[%s4505_s3 + $0x28] sm:$0xff]  }
 0x648   :  { %3671 = vpow2.f32 %v3319_v52  ;;  %v3587_v15 = vld [vmem:[%s4505_s3 + $0x30] sm:$0xff]   ;;  %v3588_v52 = vld [vmem:[%s4505_s3 + $0x38] sm:$0xff]  }
 0x649   :  { %3673 = vtanh.f32 %v2219_v41 }
 0x64a   :  { %3675 = vpow2.f32 %v3320_v63  ;;  %v2881_v63 = vpack.c.bf16 %v4311_v19, %v4199_v46 }
 0x651   :  { %v3670_v20 = vpop.eup %3669 }
 0x652   :  { %v2229_v43 = vadd.f32 1.0, %v3670_v20  ;;  %v3672_v22 = vpop.eup %3671 }
 0x653   :  { %v2230_v23 = vadd.f32 1.0, %v3672_v22  ;;  %v3674_v25 = vpop.eup %3673 }
 0x654   :  { %3677 = vrcp.f32 %v2229_v43  ;;  %v3676_v28 = vpop.eup %3675 }
 0x655   :  { %3679 = vrcp.f32 %v2230_v23  ;;  %v2231_v35 = vadd.f32 1.0, %v3676_v28  ;;  %v4539_v23 = vld [vmem:[#allocation29_spill] sm:$0xff] }
 0x656   :  { %v4540_v28 = vld [vmem:[#allocation21_spill] sm:$0xff] }
 0x657   :  { %3681 = vrcp.f32 %v2231_v35  ;;  %v4541_v35 = vld [vmem:[#allocation30_spill] sm:$0xff] }
 0x65e   :  { %v3678_v30 = vpop.eup %3677 }
 0x65f   :  { %v2240_v33 = vmul.f32 %v3678_v30, %v3674_v25  ;;  %v3680_v51 = vpop.eup %3679 }
 0x660   :  { %v2239_v36 = vmul.f32 %v3680_v51, %v4354_v26 }
 0x661   :  { %v3682_v38 = vpop.eup %3681 }
 0x662   :  { %v4400_v37 = vadd.f32 %v2240_v33, %v2239_v36 }
 0x664   :  { %3683 = vtanh.f32 %v4400_v37 }
 0x66e   :  { %v3684_v39 = vpop.eup %3683 }
 0x66f   :  { %v4403_v3 = vmul.f32 %v3684_v39, %v3682_v38 }
 0x671   :  { %v2253_v53 = vpack.c.bf16 %v4403_v3, %v4403_v3  ;;  %v2882_v20 = vpack.c.bf16 %v4403_v3, %v4357_v32 }
 0x673   :  { %2479 = vmatmul.mubr.bf16.vlgmr.msra.gmra.mrb[36].mxu0 %v2253_v53  ;;  %2520 = vmatmul.mubr.bf16.vlgmr.msra.gmra.mrb[44].mxu1 %v2253_v53 }
 0x674   :  { %2759 = vmatpush1.bf16.msra.mxu0 %v4209_v0  ;;  %2800 = vmatpush1.bf16.msra.mxu1 %v4211_v55 }
 0x675   :  { %2760 = vmatprep.subr.bf16.mxu0 %v4217_v34  ;;  %2801 = vmatprep.subr.bf16.mxu1 %v4219_v2  ;;  %v4535_v34 = vld [vmem:[#allocation27_spill] sm:$0xff] }
 0x676   :  { %2790 = vmatprep.mubr.bf16.mxu0 %v4526_v61  ;;  %2831 = vmatprep.mubr.bf16.mxu1 %v4526_v61  ;;  %v3581_v61 = vld [vmem:[%s4505_s3] sm:$0xff]  }
 0x678   :  { %2761 = vmatpush1.bf16.msra.mxu0 %v4221_v27  ;;  %2802 = vmatpush1.bf16.msra.mxu1 %v4223_v21  ;;  %v4536_v27 = vld [vmem:[#allocation19_spill] sm:$0xff] }
 0x679   :  { %2762 = vmatprep.subr.bf16.mxu0 %v4229_v58  ;;  %2803 = vmatprep.subr.bf16.mxu1 %v4231_v5 }
 0x67c   :  { %2763 = vmatpush1.bf16.msra.mxu0 %v4233_v29  ;;  %2804 = vmatpush1.bf16.msra.mxu1 %v4235_v17  ;;  %v4537_v29 = vld [vmem:[#allocation28_spill] sm:$0xff] }
 0x67d   :  { %2764 = vmatprep.subr.bf16.mxu0 %v4241_v47  ;;  %2805 = vmatprep.subr.bf16.mxu1 %v4243_v59  ;;  %v4538_v47 = vld [vmem:[#allocation20_spill] sm:$0xff] }
 0x680   :  { %2765 = vmatpush1.bf16.msra.mxu0 %v4245_v49  ;;  %2806 = vmatpush1.bf16.msra.mxu1 %v4247_v60 }
 0x681   :  { %2766 = vmatprep.subr.bf16.mxu0 %v4253_v31  ;;  %2807 = vmatprep.subr.bf16.mxu1 %v4255_v50 }
 0x684   :  { %2767 = vmatpush1.bf16.msra.mxu0 %v4257_v57  ;;  %2808 = vmatpush1.bf16.msra.mxu1 %v4259_v62 }
 0x685   :  { %2768 = vmatprep.subr.bf16.mxu0 %v4267_v10  ;;  %2809 = vmatprep.subr.bf16.mxu1 %v4271_v13 }
 0x688   :  { %2769 = vmatpush1.bf16.msra.mxu0 %v4265_v1  ;;  %2810 = vmatpush1.bf16.msra.mxu1 %v4269_v16 }
 0x689   :  { %2770 = vmatprep.subr.bf16.mxu0 %v4273_v56  ;;  %2811 = vmatprep.subr.bf16.mxu1 %v4276_v24 }
 0x68c   :  { %2771 = vmatpush1.bf16.msra.mxu0 %v4281_v4  ;;  %2812 = vmatpush1.bf16.msra.mxu1 %v4283_v6 }
 0x68d   :  { %2772 = vmatprep.subr.bf16.mxu0 %v4287_v8  ;;  %2813 = vmatprep.subr.bf16.mxu1 %v4289_v9 }
 0x690   :  { %2773 = vmatpush1.bf16.msra.mxu0 %v4293_v11  ;;  %2814 = vmatpush1.bf16.msra.mxu1 %v4295_v12 }
 0x691   :  { %3451 = vmatprep.subr.bf16.mxu0 %v3581_v61 }
 0x746   :  { %v2480_v0 = vpop.f32.mrb[36].mxu0  ;;  %v2521_v55 = vpop.f32.mrb[44].mxu1 }
 0x747   :  { %v2528_v2 = vadd.f32 %v2480_v0, %v4535_v34  ;;  %v2530_v21 = vadd.f32 %v2521_v55, %v4536_v27  ;;  %v2482_v58 = vpop.f32.mrb[37].mxu0  ;;  %v2523_v5 = vpop.f32.mrb[45].mxu1 }
 0x748   :  { %v2529_v17 = vadd.f32 %v2482_v58, %v4537_v29  ;;  %v2531_v59 = vadd.f32 %v2523_v5, %v4538_v47  ;;  %v2484_v49 = vpop.f32.mrb[38].mxu0  ;;  %v2525_v60 = vpop.f32.mrb[46].mxu1 }
 0x749   :  { %v3353_v31 = vmul.f32 -1.442695, %v2528_v2  ;;  %v2485_v50 = vpop.f32.mrb[39].mxu0  ;;  %v2526_v57 = vpop.f32.mrb[47].mxu1  ;;  %v3355_v1 = vmul.f32 -1.442695, %v2530_v21 }
 0x74a   :  { %v3354_v62 = vmul.f32 -1.442695, %v2529_v17  ;;  %v3391_v49 = vld [vmem:[%s4506_s4] ss:$0 sm:$0xff]  ;;  %s3796_s4 = smov [#allocation11]  }
 0x74b   :  { %3685 = vpow2.f32 %v3353_v31  ;;  %s3069_s22 = sshll.u32 %s3796_s4, 4  ;;  %s3070_s22 = int_to_ptr.vmem [resolvable:$true] %s3069_s22 }
 0x74c   :  { %3687 = vpow2.f32 %v3354_v62  ;;  %s3761_s23 = scalar_lea.vmem %s3070_s22, 512  ;;  %p3766_p3 = scmp.lt.s32.totalorder %s3070_s22, %s3070_s22 }
 0x74d   :  { %3689 = vtanh.f32 %v2531_v59  ;;  %p3762_p2 = scmp.ne.s32.totalorder %s3070_s22, %s3761_s23  ;;  %p3767_p4 = scmp.lt.s32.totalorder %s3761_s23, %s3761_s23 }
 0x74e   :  { %3691 = vpow2.f32 %v3355_v1 }
 0x74f   :  { %p3768_p5 = por %p3767_p4, %p3766_p3 }
 0x751   :  { %p3769_p6 = pnand %p3768_p5, %p3762_p2 }
 0x755   :  { %v3686_v10 = vpop.eup %3685 }
 0x756   :  { %v2541_v16 = vadd.f32 1.0, %v3686_v10  ;;  %v3688_v13 = vpop.eup %3687 }
 0x757   :  { %v2542_v56 = vadd.f32 1.0, %v3688_v13  ;;  %v3690_v24 = vpop.eup %3689 }
 0x758   :  { %3693 = vrcp.f32 %v2541_v16  ;;  %v3692_v4 = vpop.eup %3691 }
 0x759   :  { %3695 = vrcp.f32 %v2542_v56  ;;  %v2543_v11 = vadd.f32 1.0, %v3692_v4 }
 0x75b   :  { %3697 = vrcp.f32 %v2543_v11 }
 0x762   :  { %v3694_v6 = vpop.eup %3693 }
 0x763   :  { %v2552_v8 = vmul.f32 %v3694_v6, %v3690_v24  ;;  %v3696_v9 = vpop.eup %3695 }
 0x764   :  { %v2551_v12 = vmul.f32 %v3696_v9, %v4400_v37  ;;  %v4542_v37 = vld [vmem:[#allocation22_spill] sm:$0xff] }
 0x765   :  { %v3698_v7 = vpop.eup %3697 }
 0x766   :  { %v4447_v26 = vadd.f32 %v2552_v8, %v2551_v12 }
 0x768   :  { %3699 = vtanh.f32 %v4447_v26 }
 0x772   :  { %v3700_v40 = vpop.eup %3699 }
 0x773   :  { %v4450_v54 = vmul.f32 %v3700_v40, %v3698_v7 }
 0x775   :  { %v2565_v41 = vpack.c.bf16 %v4450_v54, %v4450_v54 }
 0x777   :  { %2791 = vmatmul.mubr.bf16.vlgmr.msra.gmra.mrb[40].mxu0 %v2565_v41  ;;  %2832 = vmatmul.mubr.bf16.vlgmr.msra.gmra.mrb[48].mxu1 %v2565_v41 }
 0x778   :  { %3452 = vmatpush3.bf16.msra.mxu0 %v3581_v61  ;;  %3467 = vmatprep.mubr.bf16.mxu0 %v2880_v44 }
 0x779   :  { %3453 = vmatprep.subr.bf16.mxu0 %v3582_v42 }
 0x77c   :  { %3454 = vmatpush3.bf16.msra.mxu0 %v3582_v42 }
 0x77d   :  { %3455 = vmatprep.subr.bf16.mxu0 %v3583_v45 }
 0x780   :  { %3456 = vmatpush3.bf16.msra.mxu0 %v3583_v45 }
 0x781   :  { %3457 = vmatprep.subr.bf16.mxu0 %v3584_v14 }
 0x784   :  { %3458 = vmatpush3.bf16.msra.mxu0 %v3584_v14 }
 0x785   :  { %3459 = vmatprep.subr.bf16.mxu0 %v3585_v48 }
 0x788   :  { %3460 = vmatpush3.bf16.msra.mxu0 %v3585_v48 }
 0x789   :  { %3461 = vmatprep.subr.bf16.mxu0 %v3586_v18 }
 0x78c   :  { %3462 = vmatpush3.bf16.msra.mxu0 %v3586_v18 }
 0x78d   :  { %3463 = vmatprep.subr.bf16.mxu0 %v3587_v15 }
 0x790   :  { %3464 = vmatpush3.bf16.msra.mxu0 %v3587_v15 }
 0x791   :  { %3465 = vmatprep.subr.bf16.mxu0 %v3588_v52 }
 0x794   :  { %3466 = vmatpush3.bf16.msra.mxu0 %v3588_v52 }
 0x797   :  { %3468 = vmatmul.mubr.bf16.vlgmr.msra.gmra.mrb[44].mxu0 %v2881_v63 }
 0x798   :  { %3471 = vmatprep.mubr.bf16.mxu0 %v2882_v20 }
 0x84a   :  { %v2792_v43 = vpop.f32.mrb[40].mxu0  ;;  %v2833_v22 = vpop.f32.mrb[48].mxu1 }
 0x84b   :  { %v2840_v25 = vadd.f32 %v2792_v43, %v4539_v23  ;;  %v2842_v30 = vadd.f32 %v2833_v22, %v4540_v28  ;;  %v2794_v33 = vpop.f32.mrb[41].mxu0  ;;  %v2835_v51 = vpop.f32.mrb[49].mxu1 }
 0x84c   :  { %v2841_v36 = vadd.f32 %v2794_v33, %v4541_v35  ;;  %v2843_v38 = vadd.f32 %v2835_v51, %v4542_v37  ;;  %v2796_v39 = vpop.f32.mrb[42].mxu0  ;;  %v2837_v53 = vpop.f32.mrb[50].mxu1 }
 0x84d   :  { %v3388_v46 = vmul.f32 -1.442695, %v2840_v25  ;;  %v2797_v19 = vpop.f32.mrb[43].mxu0  ;;  %v2838_v61 = vpop.f32.mrb[51].mxu1  ;;  %v3390_v3 = vmul.f32 -1.442695, %v2842_v30 }
 0x84e   :  { %v3389_v32 = vmul.f32 -1.442695, %v2841_v36 }
 0x84f   :  { %3701 = vpow2.f32 %v3388_v46 }
 0x850   :  { %3703 = vpow2.f32 %v3389_v32 }
 0x851   :  { %3705 = vtanh.f32 %v2843_v38 }
 0x852   :  { %3707 = vpow2.f32 %v3390_v3 }
 0x859   :  { %v3702_v0 = vpop.eup %3701 }
 0x85a   :  { %v2853_v55 = vadd.f32 1.0, %v3702_v0  ;;  %v3704_v34 = vpop.eup %3703 }
 0x85b   :  { %v2854_v2 = vadd.f32 1.0, %v3704_v34  ;;  %v3706_v27 = vpop.eup %3705 }
 0x85c   :  { %3709 = vrcp.f32 %v2853_v55  ;;  %v3708_v21 = vpop.eup %3707 }
 0x85d   :  { %3711 = vrcp.f32 %v2854_v2  ;;  %v2855_v17 = vadd.f32 1.0, %v3708_v21 }
 0x85f   :  { %3713 = vrcp.f32 %v2855_v17 }
 0x866   :  { %v3710_v58 = vpop.eup %3709 }
 0x867   :  { %v2864_v5 = vmul.f32 %v3710_v58, %v3706_v27  ;;  %v3712_v29 = vpop.eup %3711 }
 0x868   :  { %v2863_v47 = vmul.f32 %v3712_v29, %v4447_v26 }
 0x869   :  { %v3714_v24 = vpop.eup %3713 }
 0x86a   :  { %v3469_v59 = vpop.f32.mrb[44].mxu0  ;;  %v2865_v60 = vadd.f32 %v2864_v5, %v2863_v47 }
 0x86b   :  { %v2989_v31 = vpop.f32.mrb[45].mxu0  ;;  %v2998_v57 = vadd.f32 %v3469_v59, %v3391_v49 }
 0x86c   :  { %v3470_v50 = vpop.f32.mrb[46].mxu0  ;;  %3715 = vtanh.f32 %v2865_v60  ;;  %v2990_v10 = vadd.f32 %v3391_v49, %v2989_v31 }
 0x86d   :  { %v3001_v62 = vadd.f32 %v3470_v50, %v3391_v49  ;;  %v2992_v1 = vpop.f32.mrb[47].mxu0 }
 0x86e   :  { %v2993_v16 = vadd.f32 %v3391_v49, %v2992_v1 }
 0x86f   :  { %v3424_v13 = vpack.c.bf16 %v3001_v62, %v2998_v57 }
 0x870   :  { %v3419_v56 = vpack.c.bf16 %v2993_v16, %v2990_v10 }
 0x871   :  { %3436 = vst [vmem:[#allocation11 + $0x8] sm:$0xff] %v3424_v13  }
 0x872   :  { %3420 = vst [vmem:[#allocation11] sm:$0xff] %v3419_v56  }
 0x876   :  { %v3716_v4 = vpop.eup %3715 }
 0x877   :  { %v2867_v6 = vmul.f32 %v3716_v4, %v3714_v24 }
 0x879   :  { %v2883_v8 = vpack.c.bf16 %v2867_v6, %v4450_v54 }
 0x87b   :  { %3472 = vmatmul.mubr.bf16.gmra.mrb[48].mxu0 %v2883_v8 }
 0x94e   :  { %v3473_v9 = vpop.f32.mrb[48].mxu0 }
 0x94f   :  { %v3005_v11 = vpop.f32.mrb[49].mxu0  ;;  %v3014_v26 = vadd.f32 %v3473_v9, %v3391_v49 }
 0x950   :  { %v3474_v12 = vpop.f32.mrb[50].mxu0  ;;  %v3006_v41 = vadd.f32 %v3391_v49, %v3005_v11 }
 0x951   :  { %v3017_v7 = vadd.f32 %v3474_v12, %v3391_v49  ;;  %v3008_v40 = vpop.f32.mrb[51].mxu0 }
 0x952   :  { %v3009_v42 = vadd.f32 %v3391_v49, %v3008_v40 }
 0x953   :  { %v3434_v44 = vpack.c.bf16 %v3017_v7, %v3014_v26 }
 0x954   :  { %v3429_v45 = vpack.c.bf16 %v3009_v42, %v3006_v41 }
 0x955   :  { %3438 = vst [vmem:[#allocation11 + $0x18] sm:$0xff] %v3434_v44  }
 0x956   :  { %3437 = vst [vmem:[#allocation11 + $0x10] sm:$0xff] %v3429_v45  }
 0x957   :  { %3772 = shalt.err (!%p3769_p6)
}
 0x958   :  { %s3773_s26 = scalar_lea.hbm %s4507_s5, 512 }
 0x959   :  { %p3774_p7 = scmp.ne.s32.totalorder %s4507_s5, %s3773_s26  ;;  %p3777_p8 = scmp.lt.u32.totalorder %s3773_s26, %s4507_s5 }
 0x95b   :  { %p3779_p9 = pnand %p3777_p8, %p3774_p7 }
 0x95d   :  { %3782 = shalt.err (!%p3779_p9)
}
 0x95e   :  { %s3797_s6 = smov 64   ;;  %s3798_s7 = smov 4  }
 0x95f   :  { %3075 = dma.vmem_to_hbm [thread:$0]  %s3070_s22, 512, %s4507_s5, [#allocation8], %s3797_s6, %s3797_s6, %s3798_s7  }
 0x960   :  { %3787 = dma.done.wait [#allocation8], 512  }
 0x961   :  { %3788 = vsyncadd [#allocation8], 4294966784 }
 0x962   :  { %3079 = vsyncpa [#allocation7], 1 }
 0x963   :  { %3080 = vsyncpa [#allocation10], 1 }
 0x964   :  { %3081 = vsyncpa [#allocation8], 1 }

</bundles_post_ra>
